<compile_context>
chip_gen: v7x
topology: tpu7x:2x2x1
jax: 0.10.0
libtpu: 0.0.40
codegen_flags: <defaults>
</compile_context>

<pallas_src>
import jax
import jax.numpy as jnp
from jax.experimental import pallas as pl
from jax.experimental.pallas import tpu as pltpu

IN_SIZE = 448   # module hardcodes clamping of the box to [0, 448]
OUT_SIZE = 224  # module hardcodes resize target 224x224


def _clamped_box(a, b, c):
    """Static crop box, clamped to the 448x448 frame (both ends, unlike the original)."""
    a, b, c = int(a), int(b), int(c)
    x_tl = min(max(a - c, 0), IN_SIZE)
    y_tl = min(max(b - c, 0), IN_SIZE)
    x_br = min(max(a + c, 0), IN_SIZE)
    y_br = min(max(b + c, 0), IN_SIZE)
    return x_tl, y_tl, x_br, y_br


def _hat_weights(tl, br, out_size, in_size):
    """(out_size, in_size) f32 bilinear resampling weights (cv2 INTER_LINEAR, half-pixel).

    Output pixel o maps to source coord tl + (o+0.5)*scale - 0.5, clamped to [tl, br-1].
    Rows sum to 1; columns outside [tl, br) get zero weight, so the crop happens
    implicitly inside the matmul.
    """
    tl_f = float(tl)
    br_f = float(max(br, tl + 1))  # guard degenerate boxes
    scale = (br_f - tl_f) / float(out_size)
    o = jnp.arange(out_size, dtype=jnp.float32)
    src = jnp.clip(tl_f + (o + 0.5) * scale - 0.5, tl_f, br_f - 1.0)      # (out,)
    i = jnp.arange(in_size, dtype=jnp.float32)                            # (in,)
    return jnp.maximum(0.0, 1.0 - jnp.abs(src[:, None] - i[None, :]))     # (out, in)


def _aligned_window(lo, hi, align, total):
    """Smallest window [k*size, (k+1)*size) with size % align == 0, inside [0, total),
    containing [lo, hi).  Offset is block_index * block_size, so it works with a plain
    Blocked BlockSpec.  Falls back to (0, total) (never worse than fetching everything)."""
    lo = max(0, min(int(lo), total - 1))
    hi = max(lo + 1, min(int(hi), total))
    size = ((hi - lo + align - 1) // align) * align
    while size < total:
        k = lo // size
        end = k * size + size
        if end >= hi and end <= total:
            return k * size, size
        size += align
    return 0, total


def _window_weights(tl, br, off, win):
    """bf16 (OUT_SIZE, win) resampling weights restricted to the fetched window,
    renormalized after the bf16 cast so rows still sum to ~1 (removes the DC shift)."""
    w = _hat_weights(tl, br, OUT_SIZE, IN_SIZE)[:, off:off + win]          # (224, win) f32
    w_lp = w.astype(jnp.bfloat16).astype(jnp.float32)
    row_sum = jnp.maximum(jnp.sum(w_lp, axis=1, keepdims=True), 1e-6)
    return (w_lp / row_sum).astype(jnp.bfloat16)


def _crop_resize_kernel(x_ref, wx_ref, wy_ref, o_ref):
    # x_ref : VMEM (B, HB, WB)   input window (channel squeezed; BGR-flipped by index_map)
    # wx_ref: VMEM (WB, 224) bf16   x-resample weights (pre-transposed in the wrapper)
    # wy_ref: VMEM (224, HB) bf16   y-resample weights
    # o_ref : VMEM (B, 224, 224)
    bsz, hb, wb = x_ref.shape
    img = x_ref[...]
    if img.dtype != jnp.bfloat16:        # no-op when the producer already hands us bf16
        img = img.astype(jnp.bfloat16)

    # x-resample: one long MXU run over all B planes at once.
    tmp = jnp.dot(img.reshape(bsz * hb, wb), wx_ref[...],
                  preferred_element_type=jnp.float32)                    # (B*HB, 224)
    tmp = tmp.reshape(bsz, hb, OUT_SIZE).astype(jnp.bfloat16)

    # y-resample: static-unrolled per-plane MXU matmuls (no broadcast of W_y).
    wy = wy_ref[...]
    for p in range(bsz):
        o_ref[p] = jnp.dot(wy, tmp[p],
                           preferred_element_type=jnp.float32).astype(o_ref.dtype)


def _pick_batch(N, C):
    """Planes per grid step: largest divisor of N <= 4, but on tiny grids prefer an even
    total step count so v7x's two TensorCores get balanced work."""
    divisors = [d for d in (4, 3, 2, 1) if N % d == 0]
    best = divisors[0]
    steps = (N // best) * C
    if steps < 8 and steps % 2 == 1:
        for d in divisors:
            if ((N // d) * C) % 2 == 0:
                return d
    return best


def crop_amplificate(x, a, b, c):
    """x: (N, C, 448, 448) float32 or bfloat16; a/b/c: static Python ints
    (box center (a, b), half-size c).  Returns (N, C, 224, 224) in x.dtype."""
    N, C, H, W = x.shape
    assert H == IN_SIZE and W == IN_SIZE, "module hardcodes 448x448 input"

    x_tl, y_tl, x_br, y_br = _clamped_box(a, b, c)

    # Crop-aware DMA: aligned row window (sublane, multiples of 8) and column window
    # (lane, multiples of 128) that cover the box.  Static block indices ky/kx.
    y_off, HB = _aligned_window(y_tl, y_br, 8, IN_SIZE)
    x_off, WB = _aligned_window(x_tl, x_br, 128, IN_SIZE)
    ky, kx = y_off // HB, x_off // WB

    # Grid-invariant resampling weights over the fetched window only (bf16, renormalized).
    w_x_t = _window_weights(x_tl, x_br, x_off, WB).T          # (WB, 224)
    w_y = _window_weights(y_tl, y_br, y_off, HB)              # (224, HB)

    B = _pick_batch(N, C)

    grid_spec = pltpu.PrefetchScalarGridSpec(
        num_scalar_prefetch=0,
        grid=(N // B, C),
        in_specs=[
            # channel flip in the index_map implements cv2 RGB->BGR; only the crop window
            # of rows/cols is DMA'd.
            pl.BlockSpec((B, pl.Squeezed(), HB, WB),
                         lambda ni, ci: (ni, C - 1 - ci, ky, kx)),
            # weights: constant block index -> DMA'd once, VMEM-resident.
            pl.BlockSpec((WB, OUT_SIZE), lambda ni, ci: (0, 0)),
            pl.BlockSpec((OUT_SIZE, HB), lambda ni, ci: (0, 0)),
        ],
        out_specs=pl.BlockSpec((B, pl.Squeezed(), OUT_SIZE, OUT_SIZE),
                               lambda ni, ci: (ni, ci, 0, 0)),
    )

    return pl.pallas_call(
        _crop_resize_kernel,
        out_shape=jax.ShapeDtypeStruct((N, C, OUT_SIZE, OUT_SIZE), x.dtype),
        grid_spec=grid_spec,
        compiler_params=pltpu.CompilerParams(
            dimension_semantics=("parallel", "parallel"),
            vmem_limit_bytes=32 * 1024 * 1024,   # headroom for B=4 f32 input on v5e
        ),
    )(x, w_x_t, w_y)


if __name__ == "__main__":
    key = jax.random.PRNGKey(0)
    N, C = 2, 3  # RGB images (module assumes 3 channels, 448x448 spatial)
    x_f32 = jax.random.uniform(key, (N, C, IN_SIZE, IN_SIZE), dtype=jnp.float32)
    # bf16 at the HBM boundary (perf feedback): the producer hands the kernel bf16 data.
    x = x_f32.astype(jnp.bfloat16)

    # f32 view of exactly what the kernel sees, for the reference.
    x_seen = x.astype(jnp.float32)
    x_bgr = x_seen[:, ::-1, :, :]

    # One interior box and one box touching the frame edges (exercises the clamps).
    for (a, b, c) in [(200, 240, 150), (60, 400, 100)]:
        out = jax.block_until_ready(crop_amplificate(x, a, b, c))
        assert out.shape == (N, C, OUT_SIZE, OUT_SIZE)
        out_f32 = out.astype(jnp.float32)
        assert bool(jnp.all(jnp.isfinite(out_f32)))

        # f32 pure-JAX reference (crop+BGR+bilinear via the same clamped box / weights).
        x_tl, y_tl, x_br, y_br = _clamped_box(a, b, c)
        wy_f = _hat_weights(y_tl, y_br, OUT_SIZE, IN_SIZE)
        wx_f = _hat_weights(x_tl, x_br, OUT_SIZE, IN_SIZE)
        ref = jnp.einsum("oh,nchw,pw->ncop", wy_f, x_bgr, wx_f)
        max_err = float(jnp.max(jnp.abs(out_f32 - ref)))
        assert max_err < 2e-2, f"box {(a, b, c)}: max abs error vs f32 reference {max_err}"

    print("KERNEL_OK")
</pallas_src>

<mosaic_0001>
module attributes {stable_mosaic.version = 11 : i64} {
  func.func @_crop_resize_kernel(%arg0: i32, %arg1: i32, %arg2: memref<1x1x392x384xbf16, #tpu.memory_space<vmem>>, %arg3: memref<384x224xbf16, #tpu.memory_space<vmem>>, %arg4: memref<224x392xbf16, #tpu.memory_space<vmem>>, %arg5: memref<1x1x224x224xbf16, #tpu.memory_space<vmem>>) attributes {dimension_semantics = [#tpu.dimension_semantics<parallel>, #tpu.dimension_semantics<parallel>], iteration_bounds = array<i64: 2, 3>, scalar_prefetch = 0 : i64, scratch_operands = 0 : i64, tpu.core_type = #tpu.core_type<tc>, window_params = [{transform_indices = @transform_0, window_bounds = array<i64: 1, 1, 392, 384>}, {pipeline_mode = #tpu.pipeline_mode<synchronous>, transform_indices = @transform_1, window_bounds = array<i64: 384, 224>}, {pipeline_mode = #tpu.pipeline_mode<synchronous>, transform_indices = @transform_2, window_bounds = array<i64: 224, 392>}, {transform_indices = @transform_3, window_bounds = array<i64: 1, 1, 224, 224>}]} {
    %c0 = arith.constant 0 : index
    %c0_0 = arith.constant 0 : index
    %c0_1 = arith.constant 0 : index
    %c0_2 = arith.constant 0 : index
    %0 = vector.load %arg2[%c0, %c0_0, %c0_1, %c0_2] : memref<1x1x392x384xbf16, #tpu.memory_space<vmem>>, vector<1x1x392x384xbf16>
    %1 = vector.shape_cast %0 : vector<1x1x392x384xbf16> to vector<1x392x384xbf16>
    %2 = vector.shape_cast %1 : vector<1x392x384xbf16> to vector<392x384xbf16>
    %c0_3 = arith.constant 0 : index
    %c0_4 = arith.constant 0 : index
    %3 = vector.load %arg3[%c0_3, %c0_4] : memref<384x224xbf16, #tpu.memory_space<vmem>>, vector<384x224xbf16>
    %cst = arith.constant dense<0.000000e+00> : vector<392x224xf32>
    %4 = tpu.matmul %2, %3, %cst {dimension_numbers = #tpu.dot_dimension_numbers<[1], [0], [0], [1], [0, 0, 1, 1], [], []>} : vector<392x384xbf16>, vector<384x224xbf16>, vector<392x224xf32> -> vector<392x224xf32>
    %5 = vector.shape_cast %4 : vector<392x224xf32> to vector<1x392x224xf32>
    %6 = arith.truncf %5 : vector<1x392x224xf32> to vector<1x392x224xbf16>
    %c0_5 = arith.constant 0 : index
    %c0_6 = arith.constant 0 : index
    %7 = vector.load %arg4[%c0_5, %c0_6] : memref<224x392xbf16, #tpu.memory_space<vmem>>, vector<224x392xbf16>
    %8 = vector.shape_cast %6 : vector<1x392x224xbf16> to vector<392x224xbf16>
    %cst_7 = arith.constant dense<0.000000e+00> : vector<224x224xf32>
    %9 = tpu.matmul %7, %8, %cst_7 {dimension_numbers = #tpu.dot_dimension_numbers<[1], [0], [0], [1], [0, 0, 1, 1], [], []>} : vector<224x392xbf16>, vector<392x224xbf16>, vector<224x224xf32> -> vector<224x224xf32>
    %10 = arith.truncf %9 : vector<224x224xf32> to vector<224x224xbf16>
    %c0_8 = arith.constant 0 : index
    %c0_9 = arith.constant 0 : index
    %c0_10 = arith.constant 0 : index
    %c0_11 = arith.constant 0 : index
    %11 = vector.load %arg5[%c0_8, %c0_9, %c0_10, %c0_11] : memref<1x1x224x224xbf16, #tpu.memory_space<vmem>>, vector<1x1x224x224xbf16>
    %12 = vector.shape_cast %11 : vector<1x1x224x224xbf16> to vector<224x224xbf16>
    %13 = vector.shape_cast %10 : vector<224x224xbf16> to vector<1x1x224x224xbf16>
    tpu.vector_store %arg5[%c0_8, %c0_9, %c0_10, %c0_11], %13 {strides = array<i32>} : memref<1x1x224x224xbf16, #tpu.memory_space<vmem>>, vector<1x1x224x224xbf16>,
    return
  }
  func.func @transform_0(%arg0: i32, %arg1: i32) -> (i32, i32, i32, i32) {
    %c2_i32 = arith.constant 2 : i32
    %0 = arith.subi %c2_i32, %arg1 : i32
    %c0_i32 = arith.constant 0 : i32
    %c0_i32_0 = arith.constant 0 : i32
    %c0_i32_1 = arith.constant 0 : i32
    return %arg0, %0, %c0_i32, %c0_i32_0 : i32, i32, i32, i32
  }
  func.func @transform_1(%arg0: i32, %arg1: i32) -> (i32, i32) {
    %c0_i32 = arith.constant 0 : i32
    %c0_i32_0 = arith.constant 0 : i32
    %c0_i32_1 = arith.constant 0 : i32
    return %c0_i32, %c0_i32_0 : i32, i32
  }
  func.func @transform_2(%arg0: i32, %arg1: i32) -> (i32, i32) {
    %c0_i32 = arith.constant 0 : i32
    %c0_i32_0 = arith.constant 0 : i32
    %c0_i32_1 = arith.constant 0 : i32
    return %c0_i32, %c0_i32_0 : i32, i32
  }
  func.func @transform_3(%arg0: i32, %arg1: i32) -> (i32, i32, i32, i32) {
    %c0_i32 = arith.constant 0 : i32
    %c0_i32_0 = arith.constant 0 : i32
    %c0_i32_1 = arith.constant 0 : i32
    return %arg0, %arg1, %c0_i32, %c0_i32_0 : i32, i32, i32, i32
  }
}

</mosaic_0001>

<bundles_post_ra>
// kernel: tpu_custom_call.1
= control target key start
LH: loop header
LB: loop body
LE: loop exit
PB: predicated region body
PF: predicated region fallthrough
CT: control target
= control target key end

     0   :  { %8 = vsyncpa [#allocation3], 0  ;;  %s4788_s0 = inlined_call_operand.hbm [shape: bf16[2,3,448,448], index: 0, kind: input, shape index: {}]   ;;  %s4789_s1 = inlined_call_operand.vmem [shape: bf16[384,224], index: 1, kind: input, shape index: {}]   ;;  %s4790_s2 = inlined_call_operand.vmem [shape: bf16[224,392], index: 2, kind: input, shape index: {}]   ;;  %s4791_s3 = inlined_call_operand.hbm [shape: bf16[2,3,224,224], index: 3, kind: output, shape index: {}]  }
   0x1   :  { %10 = vsyncpa [#allocation3 + $0x1], 0 }
   0x2   :  { %11 = vsyncpa [#allocation4], 0 }
   0x3   :  { %13 = vsyncpa [#allocation4 + $0x1], 0  ;;  %s3608_s12 = smov 0   ;;  %s3610_s13 = smov 0  }
   0x4   :  { %s3612_s14 = smov 0   ;;  %s3614_s15 = smov 0  }
   0x5   :  { %s3616_s16 = smov 0   ;;  %s3618_s17 = smov 0  }
   0x6   :  { %s3620_s18 = smov 0   ;;  %s3622_s19 = smov 0  }
   0x7   :  { %s3624_s20 = smov 0   ;;  %s3626_s21 = smov 0  }
   0x8   :  { %s3628_s22 = smov 0  }
   0x9 LB: > { %4798 = sst [smem:[#allocation8_spill]] %s3558_s17  ;;  %s2627_s23 = sadd.s32 4294967295, %s3578_s22   ;;  %s3578_s22 = sphi %s3628_s22, %s19_s22   ;;  %s3574_s21 = sphi %s3626_s21, %s4856_s21   ;;  %s3570_s20 = sphi %s3624_s20, %s4855_s20   ;;  %s3566_s19 = sphi %s3622_s19, %s4854_s19   ;;  %s3562_s18 = sphi %s3620_s18, %s4853_s18   ;;  %s3558_s17 = sphi %s3618_s17, %s4845_s17   ;;  %s3554_s16 = sphi %s3616_s16, %s4852_s16   ;;  %s3550_s15 = sphi %s3614_s15, %s4851_s15   ;;  %s3546_s14 = sphi %s3612_s14, %s4850_s14   ;;  %s3542_s13 = sphi %s3610_s13, %s4849_s13   ;;  %s3538_s12 = sphi %s3608_s12, %s4848_s12  }
   0xa   : > { %s2628_s24 = sadd.s32 4294967294, %s3578_s22   ;;  %s28_s25 = sadd.s32 1, %s3570_s20 }
   0xb   : > { %s31_s26 = sadd.s32 1, %s3574_s21  ;;  %p29_p0 = scmp.ge.s32.totalorder %s28_s25, 3 }
   0xc   : > { %s35_s27 = ssub.s32 2, %s3570_s20  ;;  %s42_s28 = sadd.s32 1, %s3558_s17 }
   0xd   : > { %p49_p1 = scmp.ne.s32.totalorder %s3558_s17, %s3554_s16  ;;  %s4858_s25 = smov (%p29_p0, %s28_s25), 0 }
   0xe   : > { %4799 = sst [smem:[#allocation9_spill]] %s4858_s25  ;;  %s4860_s26 = smov (!%p29_p0, %s31_s26), %s3574_s21 }
   0xf   : > { %s36_s29 = ssub.s32 2, %s4858_s25  ;;  %p50_p2 = scmp.eq.s32.totalorder %s3578_s22, 0 }
  0x10   : > { %p33_p3 = scmp.ge.s32.totalorder %s4860_s26, 2  ;;  %s38_s30 = ssub.s32 %s35_s27, %s36_s29 }
  0x11   : > { %p3678_p4 = por %p50_p2, %p49_p1  ;;  %p55_p5 = scmp.ne.s32.totalorder %s3554_s16, %s3550_s15 }
  0x12   : > { %s4862_s26 = smov (%p33_p3, %s4860_s26), 0  ;;  %p56_p6 = scmp.eq.s32.totalorder %s2627_s23, 0 }
  0x13   : > { %4801 = sst [smem:[#allocation10_spill]] %s4862_s26  ;;  %s108_s5 = ssub.s32 %s3570_s20, %s4858_s25 }
  0x14   : > { %s37_s6 = ssub.s32 %s3574_s21, %s4862_s26  ;;  %s112_s7 = sadd.s32 1, %s3546_s14 }
  0x15   : > { %s39_s8 = sor.u32 %s38_s30, %s37_s6  ;;  %p3693_p7 = por %p56_p6, %p55_p5 }
  0x16   : > { %p40_p8 = scmp.eq.s32.totalorder %s39_s8, 0  ;;  %s109_s10 = sor.u32 %s108_s5, %s37_s6 }
  0x17   : > { %p110_p9 = scmp.eq.s32.totalorder %s109_s10, 0  ;;  %p122_p10 = scmp.ne.s32.totalorder %s3546_s14, %s3542_s13 }
  0x18   : > { %s3700_s11 = scalar_select %p40_p8, %s3558_s17, %s42_s28  }
  0x19   : > { %s3703_s15 = scalar_select %p110_p9, %s3546_s14, %s112_s7  }
  0x1a   : > { %4803 = sst [smem:[#allocation11_spill]] %s3700_s11  ;;  %p123_p11 = scmp.eq.s32.totalorder %s2627_s23, 5 }
  0x1b   : > { %p128_p12 = scmp.ne.s32.totalorder %s3542_s13, %s3538_s12  ;;  %p129_p13 = scmp.eq.s32.totalorder %s2628_s24, 5 }
  0x1c   : > { %p3711_p0 = por %p123_p11, %p122_p10  ;;  %p3075_p1 = scmp.lt.s32.totalorder %s3578_s22, 6 }
  0x1d   : > { %p3716_p2 = por %p129_p13, %p128_p12  ;;  %s155_s5 = sand.u32 1, %s3558_s17  }
  0x1e   : > { %s4804_s29 = scalar_select %p3711_p0, 1, 0 }
  0x1f   : > { %s4805_s30 = scalar_select %p3716_p2, 1, 0 }
  0x20   : > { %s3056_s28 = smul.u32 588, %s155_s5  ;;  %p3725_p3 = pnand %p3075_p1, %p3678_p4 }
  0x21   : > { %s3057_s6 = smul.u32 224, %s35_s27  ;;  %s3738_s27 = scalar_lea.sflag [#allocation3], %s155_s5 }
  0x22   : > { %s3058_s24 = smul.u32 672, %s3574_s21  ;;  %s159_s7 = scalar_lea.vmem [#allocation2], %s3056_s28 }
  0x23   : > { %s169_s8 = sshll.u32 %s159_s7, 4  ;;  %p3428_p6 = pneg %p3725_p3  ;;  %s3730_s8 = int_to_ptr.vmem [resolvable:$true] %s169_s8 }
  0x24   : > { %s166_s10 = sadd.s32 %s3058_s24, %s3057_s6  ;;  %s3431_s25 = scalar_lea.hbm %s4788_s0, 86016 }
  0x25   : > { %s2631_s26 = sshll.u32 %s166_s10, 6 }
  0x26   : > { %s3735_s17 = scalar_lea.hbm %s4788_s0, %s2631_s26 }
  0x27   : > { %s3426_s4 = scalar_lea.hbm %s3735_s17, 9408  ;;  %p3432_p10 = scmp.lt.u32.totalorder %s3735_s17, %s4788_s0 }
  0x28   : > { %p3427_p5 = scmp.ne.s32.totalorder %s3735_s17, %s3426_s4  ;;  %p3433_p11 = scmp.lt.u32.totalorder %s3431_s25, %s3426_s4 }
  0x29   : > { %p3435_p13 = scmp.lt.u32.totalorder %s3426_s4, %s3735_s17 }
  0x2a   : > { %p3429_p8 = pnand %p3428_p6, %p3427_p5  ;;  %p3434_p12 = por %p3433_p11, %p3432_p10 }
  0x2c   : > { %p3430_p9 = pneg %p3429_p8  ;;  %p3436_p1 = por %p3435_p13, %p3434_p12 }
  0x2e   : > { %p3437_p4 = pnand %p3436_p1, %p3430_p9 }
  0x30   : > { %3440 = shalt.err (!%p3437_p4)
}
  0x31   : > { %s3441_s5 = scalar_lea.vmem %s3730_s8, 9408  ;;  %s3580_s24 = smov [#allocation2]  }
  0x32   : > { %p3442_p5 = scmp.ne.s32.totalorder %s3730_s8, %s3441_s5  ;;  %s3446_s7 = sshll.u32 %s3580_s24, 4  ;;  %s3447_s7 = int_to_ptr.vmem [resolvable:$false] %s3446_s7 }
  0x33   : > { %s3448_s10 = scalar_lea.vmem %s3447_s7, 18816  ;;  %p3449_p0 = scmp.lt.s32.totalorder %s3730_s8, %s3447_s7 }
  0x34   : > { %p3444_p8 = pnand %p3442_p5, %p3428_p6  ;;  %p3450_p10 = scmp.lt.s32.totalorder %s3448_s10, %s3441_s5 }
  0x36   : > { %p3445_p2 = pneg %p3444_p8  ;;  %p3451_p11 = por %p3450_p10, %p3449_p0 }
  0x38   : > { %p3452_p12 = pnand %p3451_p11, %p3445_p2 }
  0x3a   : > { %3455 = shalt.err (!%p3452_p12)
}
  0x3b   : > { %s3581_s4 = smov 256   ;;  %s3582_s28 = smov 192  }
  0x3c   : > { %s3583_s6 = smov 12   ;;  %p177_p4 = scmp.lt.s32.totalorder %s3578_s22, 7 }
  0x3d   : > { %3070 = dma.hbm_to_vmem [thread:$0]  (!%p3725_p3), %s3735_s17, 9408, %s3730_s8, %s3738_s27, %s3581_s4, %s3582_s28, %s3583_s6  }
  0x3e   : > { %p4807_p6 = scmp.ge.s32.totalorder %s3578_s22, 1 }
  0x40   : > { %p178_p9 = pnand %p4807_p6, %p177_p4 }
  0x42   : > { %181 = sbr.rel (%p178_p9) target bundleno = 1116 (0x45c), region = 32 }
  0x49   : > { %s183_s25 = sand.u32 1, %s3554_s16  }
  0x4a   : > { %s3059_s26 = smul.u32 588, %s183_s25  ;;  %s184_s11 = scalar_lea.sflag [#allocation3], %s183_s25 }
  0x4c   : > { %s3770_s5 = scalar_lea.vmem [#allocation2], %s3059_s26 }
  0x4d   : > { %3529 = dma.done.wait (%p3693_p7), %s184_s11, 9408  }
  0x4e   : > { %3531 = vsyncadd (%p3693_p7), %s184_s11, 4294957888  ;;  %v3171_v0 = vld [vmem:[%s4789_s1 + $0x4] ss:$8 sps:$4 sm:$0xff]   ;;  %v3173_v1 = vld [vmem:[%s4789_s1] ss:$8 sps:$4 sm:$0xff]   ;;  %v3584_v20 = vmov 0  }
  0x4f   : > { %993 = vmatprep.subr.bf16.mxu0 %v3171_v0  ;;  %v3174_v2 = vld [vmem:[%s4789_s1 + $0x14] ss:$8 sps:$4 sm:$0xff]   ;;  %v3176_v3 = vld [vmem:[%s4789_s1 + $0x10] ss:$8 sps:$4 sm:$0xff]   ;;  %v3177_v4 = vld [vmem:[%s4789_s1 + $0x24] ss:$8 sps:$4 sm:$0xff]   ;;  %1426 = vmatprep.mubr.bf16.mxu1 %v3584_v20 }
  0x50   : > { %994 = vmatpush1.bf16.msra.mxu0 %v3173_v1  ;;  %v3179_v5 = vld [vmem:[%s4789_s1 + $0x20] ss:$8 sps:$4 sm:$0xff]   ;;  %v3180_v6 = vld [vmem:[%s4789_s1 + $0x34] ss:$8 sps:$4 sm:$0xff]   ;;  %v3182_v7 = vld [vmem:[%s4789_s1 + $0x30] ss:$8 sps:$4 sm:$0xff]  }
  0x51   : > { %995 = vmatprep.subr.bf16.mxu0 %v3174_v2  ;;  %v3183_v8 = vld [vmem:[%s4789_s1 + $0x44] ss:$8 sps:$4 sm:$0xff]   ;;  %v3185_v9 = vld [vmem:[%s4789_s1 + $0x40] ss:$8 sps:$4 sm:$0xff]   ;;  %v3186_v10 = vld [vmem:[%s4789_s1 + $0x54] ss:$8 sps:$4 sm:$0xff]  }
  0x52   : > { %v3188_v11 = vld [vmem:[%s4789_s1 + $0x50] ss:$8 sps:$4 sm:$0xff]   ;;  %v3189_v12 = vld [vmem:[%s4789_s1 + $0x64] ss:$8 sps:$4 sm:$0xff]   ;;  %v3191_v14 = vld [vmem:[%s4789_s1 + $0x60] ss:$8 sps:$4 sm:$0xff]  }
  0x53   : > { %v3221_v13 = vld [vmem:[%s3770_s5 + $0x4] ss:$12 sps:$4 sm:$0xff]   ;;  %v3825_v16 = vld [vmem:[%s4789_s1 + $0x100] ss:$8 sps:$4 sm:$0xff]   ;;  %v3231_v58 = vld [vmem:[%s3770_s5 + $0x4c] ss:$12 sps:$4 sm:$0xff]  }
  0x54   : > { %996 = vmatpush1.bf16.msra.mxu0 %v3176_v3  ;;  %v3192_v15 = vld [vmem:[%s4789_s1 + $0x74] ss:$8 sps:$4 sm:$0xff]   ;;  %1025 = vmatprep.mubr.bf16.mxu0 %v3221_v13  ;;  %v3830_v17 = vld [vmem:[%s4789_s1 + $0x104] ss:$8 sps:$4 sm:$0xff]   ;;  %v3194_v18 = vld [vmem:[%s4789_s1 + $0x70] ss:$8 sps:$4 sm:$0xff]  }
  0x55   : > { %997 = vmatprep.subr.bf16.mxu0 %v3177_v4  ;;  %2886 = vmatprep.subr.bf16.mxu1 %v3830_v17  ;;  %v3195_v19 = vld [vmem:[%s4789_s1 + $0x84] ss:$8 sps:$4 sm:$0xff]   ;;  %v3844_v21 = vld [vmem:[%s4789_s1 + $0x110] ss:$8 sps:$4 sm:$0xff]   ;;  %v3849_v22 = vld [vmem:[%s4789_s1 + $0x114] ss:$8 sps:$4 sm:$0xff]  }
  0x56   : > { %2894 = vmatpush1.bf16.msra.mxu1 %v3825_v16  ;;  %v3197_v23 = vld [vmem:[%s4789_s1 + $0x80] ss:$8 sps:$4 sm:$0xff]   ;;  %v3198_v24 = vld [vmem:[%s4789_s1 + $0x94] ss:$8 sps:$4 sm:$0xff]   ;;  %v3200_v25 = vld [vmem:[%s4789_s1 + $0x90] ss:$8 sps:$4 sm:$0xff]  }
  0x57   : > { %2887 = vmatprep.subr.bf16.mxu1 %v3849_v22  ;;  %v3865_v26 = vld [vmem:[%s4789_s1 + $0x120] ss:$8 sps:$4 sm:$0xff]   ;;  %v3870_v27 = vld [vmem:[%s4789_s1 + $0x124] ss:$8 sps:$4 sm:$0xff]   ;;  %v3883_v30 = vld [vmem:[%s4789_s1 + $0x134] ss:$8 sps:$4 sm:$0xff]  }
  0x58   : > { %998 = vmatpush1.bf16.msra.mxu0 %v3179_v5  ;;  %v3201_v28 = vld [vmem:[%s4789_s1 + $0xa4] ss:$8 sps:$4 sm:$0xff]   ;;  %v3203_v29 = vld [vmem:[%s4789_s1 + $0xa0] ss:$8 sps:$4 sm:$0xff]   ;;  %v3888_v31 = vld [vmem:[%s4789_s1 + $0x130] ss:$8 sps:$4 sm:$0xff]  }
  0x59   : > { %999 = vmatprep.subr.bf16.mxu0 %v3180_v6  ;;  %v3204_v32 = vld [vmem:[%s4789_s1 + $0xb4] ss:$8 sps:$4 sm:$0xff]   ;;  %v3264_v33 = vld [vmem:[%s4789_s1 + $0x144] ss:$8 sps:$4 sm:$0xff]   ;;  %v3901_v34 = vld [vmem:[%s4789_s1 + $0x140] ss:$8 sps:$4 sm:$0xff]  }
  0x5a   : > { %2895 = vmatpush1.bf16.msra.mxu1 %v3844_v21  ;;  %v3206_v35 = vld [vmem:[%s4789_s1 + $0xb0] ss:$8 sps:$4 sm:$0xff]   ;;  %v3909_v36 = vld [vmem:[%s4789_s1 + $0x154] ss:$8 sps:$4 sm:$0xff]   ;;  %v3207_v37 = vld [vmem:[%s4789_s1 + $0xc4] ss:$8 sps:$4 sm:$0xff]  }
  0x5b   : > { %2888 = vmatprep.subr.bf16.mxu1 %v3870_v27  ;;  %v3918_v38 = vld [vmem:[%s4789_s1 + $0x150] ss:$8 sps:$4 sm:$0xff]   ;;  %v3209_v39 = vld [vmem:[%s4789_s1 + $0xc0] ss:$8 sps:$4 sm:$0xff]   ;;  %v3273_v40 = vld [vmem:[%s4789_s1 + $0x164] ss:$8 sps:$4 sm:$0xff]  }
  0x5c   : > { %1000 = vmatpush1.bf16.msra.mxu0 %v3182_v7  ;;  %v3210_v41 = vld [vmem:[%s4789_s1 + $0xd4] ss:$8 sps:$4 sm:$0xff]   ;;  %v3275_v42 = vld [vmem:[%s4789_s1 + $0x160] ss:$8 sps:$4 sm:$0xff]   ;;  %v3212_v43 = vld [vmem:[%s4789_s1 + $0xd0] ss:$8 sps:$4 sm:$0xff]  }
  0x5d   : > { %1001 = vmatprep.subr.bf16.mxu0 %v3183_v8  ;;  %v3276_v44 = vld [vmem:[%s4789_s1 + $0x174] ss:$8 sps:$4 sm:$0xff]   ;;  %v3213_v45 = vld [vmem:[%s4789_s1 + $0xe4] ss:$8 sps:$4 sm:$0xff]   ;;  %v3278_v46 = vld [vmem:[%s4789_s1 + $0x170] ss:$8 sps:$4 sm:$0xff]  }
  0x5e   : > { %2896 = vmatpush1.bf16.msra.mxu1 %v3865_v26  ;;  %v3215_v47 = vld [vmem:[%s4789_s1 + $0xe0] ss:$8 sps:$4 sm:$0xff]   ;;  %v3216_v48 = vld [vmem:[%s4789_s1 + $0xf4] ss:$8 sps:$4 sm:$0xff]   ;;  %v3218_v50 = vld [vmem:[%s4789_s1 + $0xf0] ss:$8 sps:$4 sm:$0xff]  }
  0x5f   : > { %2889 = vmatprep.subr.bf16.mxu1 %v3883_v30  ;;  %v3282_v49 = vld [vmem:[%s3770_s5 + $0x128] ss:$12 sps:$4 sm:$0xff]   ;;  %v3219_v51 = vld [vmem:[%s3770_s5] ss:$12 sps:$4 sm:$0xff]   ;;  %v3224_v54 = vld [vmem:[%s3770_s5 + $0x18] ss:$12 sps:$4 sm:$0xff]  }
  0x60   : > { %1002 = vmatpush1.bf16.msra.mxu0 %v3185_v9  ;;  %v3222_v52 = vld [vmem:[%s3770_s5 + $0x1c] ss:$12 sps:$4 sm:$0xff]   ;;  %v3286_v53 = vld [vmem:[%s3770_s5 + $0x140] ss:$12 sps:$4 sm:$0xff]   ;;  %v3290_v56 = vld [vmem:[%s3770_s5 + $0x158] ss:$12 sps:$4 sm:$0xff]  }
  0x61   : > { %1003 = vmatprep.subr.bf16.mxu0 %v3186_v10  ;;  %v3228_v55 = vld [vmem:[%s3770_s5 + $0x34] ss:$12 sps:$4 sm:$0xff]   ;;  %v3230_v57 = vld [vmem:[%s3770_s5 + $0x30] ss:$12 sps:$4 sm:$0xff]   ;;  %v3242_v2 = vld [vmem:[%s3770_s5 + $0x78] ss:$12 sps:$4 sm:$0xff]  }
  0x62   : > { %2897 = vmatpush1.bf16.msra.mxu1 %v3888_v31  ;;  %v3294_v59 = vld [vmem:[%s3770_s5 + $0x170] ss:$12 sps:$4 sm:$0xff]   ;;  %v3233_v60 = vld [vmem:[%s3770_s5 + $0x48] ss:$12 sps:$4 sm:$0xff]   ;;  %v3236_v63 = vld [vmem:[%s3770_s5 + $0x60] ss:$12 sps:$4 sm:$0xff]  }
  0x63   : > { %2890 = vmatprep.subr.bf16.mxu1 %v3264_v33  ;;  %v3234_v61 = vld [vmem:[%s3770_s5 + $0x64] ss:$12 sps:$4 sm:$0xff]   ;;  %v3298_v62 = vld [vmem:[%s3770_s5 + $0x188] ss:$12 sps:$4 sm:$0xff]   ;;  %v3302_v1 = vld [vmem:[%s3770_s5 + $0x1a0] ss:$12 sps:$4 sm:$0xff]  }
  0x64   : > { %1004 = vmatpush1.bf16.msra.mxu0 %v3188_v11  ;;  %v3240_v0 = vld [vmem:[%s3770_s5 + $0x7c] ss:$12 sps:$4 sm:$0xff]   ;;  %v3243_v3 = vld [vmem:[%s3770_s5 + $0x94] ss:$12 sps:$4 sm:$0xff]   ;;  %v3306_v4 = vld [vmem:[%s3770_s5 + $0x1b8] ss:$12 sps:$4 sm:$0xff]  }
  0x65   : > { %1005 = vmatprep.subr.bf16.mxu0 %v3189_v12  ;;  %v3245_v5 = vld [vmem:[%s3770_s5 + $0x90] ss:$12 sps:$4 sm:$0xff]   ;;  %v3246_v6 = vld [vmem:[%s3770_s5 + $0xac] ss:$12 sps:$4 sm:$0xff]   ;;  %v3248_v8 = vld [vmem:[%s3770_s5 + $0xa8] ss:$12 sps:$4 sm:$0xff]  }
  0x66   : > { %2898 = vmatpush1.bf16.msra.mxu1 %v3901_v34  ;;  %v3310_v7 = vld [vmem:[%s3770_s5 + $0x1d0] ss:$12 sps:$4 sm:$0xff]   ;;  %v3314_v10 = vld [vmem:[%s3770_s5 + $0x1e8] ss:$12 sps:$4 sm:$0xff]   ;;  %v3254_v11 = vld [vmem:[%s3770_s5 + $0xc0] ss:$12 sps:$4 sm:$0xff]  }
  0x67   : > { %2891 = vmatprep.subr.bf16.mxu1 %v3909_v36  ;;  %v3252_v9 = vld [vmem:[%s3770_s5 + $0xc4] ss:$12 sps:$4 sm:$0xff]   ;;  %v3255_v12 = vld [vmem:[%s3770_s5 + $0xdc] ss:$12 sps:$4 sm:$0xff]   ;;  %v3318_v13 = vld [vmem:[%s3770_s5 + $0x200] ss:$12 sps:$4 sm:$0xff]  }
  0x68   : > { %1006 = vmatpush1.bf16.msra.mxu0 %v3191_v14  ;;  %v3257_v14 = vld [vmem:[%s3770_s5 + $0xd8] ss:$12 sps:$4 sm:$0xff]   ;;  %vm1970_vm0 = vcmask 1043456   ;;  %vm1927_vm1 = vcmask 64512   ;;  %s207_s8 = sand.u32 1, %s3542_s13   ;;  %vm2491_vm2 = vcmask 785412  }
  0x69   : > { %1007 = vmatprep.subr.bf16.mxu0 %v3192_v15  ;;  %v3261_v15 = vld [vmem:[%s3770_s5 + $0xf4] ss:$12 sps:$4 sm:$0xff]   ;;  %s3060_s27 = smul.u32 224, %s207_s8  ;;  %vm4625_vm3 = vmor %vm2491_vm2, %vm1970_vm0  ;;  %s4727_s26 = scalar_lea.sflag [#allocation4], %s207_s8 }
  0x6a   : > { %2899 = vmatpush1.bf16.msra.mxu1 %v3918_v38  ;;  %s3061_s4 = smul.u32 56, %s3562_s18  ;;  %p4842_p0 = scmp.ne.s32.totalorder %s4804_s29, 0 }
  0x6b   : > { %2892 = vmatprep.subr.bf16.mxu1 %v3273_v40  ;;  %s4629_s10 = scalar_lea.vmem [#allocation5], %s3060_s27  ;;  %s3062_s9 = smul.u32 168, %s3566_s19 }
  0x6c   : > { %1008 = vmatpush1.bf16.msra.mxu0 %v3194_v18  ;;  %v3270_v18 = vld [vmem:[%s3770_s5 + $0x10c] ss:$12 sps:$4 sm:$0xff]   ;;  %s2537_s18 = sshll.u32 %s4629_s10, 4  ;;  %s3585_s24 = smov [#allocation5]   ;;  %s4717_s18 = int_to_ptr.vmem [resolvable:$true] %s2537_s18 }
  0x6d   : > { %1009 = vmatprep.subr.bf16.mxu0 %v3195_v19  ;;  %v3326_v19 = vld [vmem:[%s3770_s5 + $0x230] ss:$12 sps:$4 sm:$0xff]   ;;  %s2534_s28 = sadd.s32 %s3062_s9, %s3061_s4  ;;  %s3456_s11 = scalar_lea.vmem %s4717_s18, 3584 }
  0x6e   : > { %2900 = vmatpush1.bf16.msra.mxu1 %v3275_v42  ;;  %s2855_s6 = sshll.u32 %s2534_s28, 6  ;;  %p3457_p7 = scmp.ne.s32.totalorder %s4717_s18, %s3456_s11 }
  0x6f   : > { %2893 = vmatprep.subr.bf16.mxu1 %v3276_v44  ;;  %s3460_s7 = sshll.u32 %s3585_s24, 4  ;;  %s3461_s7 = int_to_ptr.vmem [resolvable:$false] %s3460_s7 }
  0x70   : > { %1010 = vmatpush1.bf16.msra.mxu0 %v3197_v23  ;;  %v3329_v23 = vld [vmem:[%s3770_s5 + $0x248] ss:$0 sps:$4 sm:$0xff]   ;;  %p3458_p2 = pnand %p3457_p7, %p4842_p0  ;;  %s3462_s17 = scalar_lea.vmem %s3461_s7, 7168 }
  0x71   : > { %1011 = vmatprep.subr.bf16.mxu0 %v3198_v24  ;;  %v3281_v24 = vld [vmem:[%s3770_s5 + $0x120] ss:$12 sps:$4 sm:$0xff]   ;;  %p3463_p13 = scmp.lt.s32.totalorder %s4717_s18, %s3461_s7  ;;  %p3464_p1 = scmp.lt.s32.totalorder %s3462_s17, %s3456_s11 }
  0x72   : > { %2901 = vmatpush1.bf16.msra.mxu1 %v3278_v46  ;;  %p3459_p3 = pneg %p3458_p2 }
  0x73   : > { %p3465_p5 = por %p3464_p1, %p3463_p13 }
  0x74   : > { %1012 = vmatpush1.bf16.msra.mxu0 %v3200_v25  ;;  %v3283_v25 = vld [vmem:[%s3770_s5 + $0x13c] ss:$12 sps:$4 sm:$0xff]  }
  0x75   : > { %1013 = vmatprep.subr.bf16.mxu0 %v3201_v28  ;;  %1427 = vmatmul.mubr.bf16.vlgmr.msra.gmra.mrb[0].mxu1 %v3282_v49  ;;  %v3289_v28 = vld [vmem:[%s3770_s5 + $0x150] ss:$12 sps:$4 sm:$0xff]   ;;  %p3466_p8 = pnand %p3465_p5, %p3459_p3 }
  0x76   : > { %1436 = vmatprep.mubr.bf16.mxu1 %v3584_v20 }
  0x78   : > { %1014 = vmatpush1.bf16.msra.mxu0 %v3203_v29  ;;  %v3291_v29 = vld [vmem:[%s3770_s5 + $0x16c] ss:$12 sps:$4 sm:$0xff]  }
  0x79   : > { %1015 = vmatprep.subr.bf16.mxu0 %v3204_v32  ;;  %v3297_v32 = vld [vmem:[%s3770_s5 + $0x180] ss:$12 sps:$4 sm:$0xff]  }
  0x7c   : > { %1016 = vmatpush1.bf16.msra.mxu0 %v3206_v35  ;;  %v3303_v35 = vld [vmem:[%s3770_s5 + $0x1b4] ss:$12 sps:$4 sm:$0xff]  }
  0x7d   : > { %1017 = vmatprep.subr.bf16.mxu0 %v3207_v37  ;;  %1437 = vmatmul.mubr.bf16.gmra.mrb[4].mxu1 %v3286_v53  ;;  %v3307_v37 = vld [vmem:[%s3770_s5 + $0x1cc] ss:$12 sps:$4 sm:$0xff]  }
  0x7e   : > { %1446 = vmatprep.mubr.bf16.mxu1 %v3584_v20 }
  0x80   : > { %1018 = vmatpush1.bf16.msra.mxu0 %v3209_v39  ;;  %v3311_v39 = vld [vmem:[%s3770_s5 + $0x1e4] ss:$12 sps:$4 sm:$0xff]  }
  0x81   : > { %1019 = vmatprep.subr.bf16.mxu0 %v3210_v41  ;;  %v3315_v41 = vld [vmem:[%s3770_s5 + $0x1fc] ss:$12 sps:$4 sm:$0xff]  }
  0x84   : > { %1020 = vmatpush1.bf16.msra.mxu0 %v3212_v43  ;;  %v3319_v43 = vld [vmem:[%s3770_s5 + $0x214] ss:$12 sps:$4 sm:$0xff]  }
  0x85   : > { %1021 = vmatprep.subr.bf16.mxu0 %v3213_v45  ;;  %1447 = vmatmul.mubr.bf16.gmra.mrb[8].mxu1 %v3290_v56  ;;  %v3323_v45 = vld [vmem:[%s3770_s5 + $0x22c] ss:$12 sps:$4 sm:$0xff]  }
  0x86   : > { %1456 = vmatprep.mubr.bf16.mxu1 %v3584_v20  ;;  %v3332_v56 = vld [vmem:[%s3770_s5 + $0x38] ss:$12 sps:$4 sm:$0xff]  }
  0x88   : > { %1022 = vmatpush1.bf16.msra.mxu0 %v3215_v47  ;;  %v3325_v47 = vld [vmem:[%s3770_s5 + $0x228] ss:$12 sps:$4 sm:$0xff]  }
  0x89   : > { %1023 = vmatprep.subr.bf16.mxu0 %v3216_v48 }
  0x8c   : > { %1024 = vmatpush1.bf16.msra.mxu0 %v3218_v50  ;;  %v3330_v50 = vld [vmem:[%s3770_s5 + $0x8] ss:$12 sps:$4 sm:$0xff]  }
  0x8d   : > { %1274 = vmatprep.subr.bf16.mxu0 %v3830_v17  ;;  %1457 = vmatmul.mubr.bf16.gmra.mrb[12].mxu1 %v3294_v59  ;;  %v3263_v17 = vld [vmem:[%s3770_s5 + $0xf0] ss:$12 sps:$4 sm:$0xff]  }
  0x8e   : > { %1466 = vmatprep.mubr.bf16.mxu1 %v3584_v20 }
  0x8f   : > { %1026 = vmatmul.mubr.bf16.vlgmr.msra.gmra.mrb[0].mxu0 %v3219_v51  ;;  %v3331_v51 = vld [vmem:[%s3770_s5 + $0x20] ss:$12 sps:$4 sm:$0xff]  }
  0x90   : > { %1035 = vmatprep.mubr.bf16.mxu0 %v3222_v52  ;;  %1275 = vmatpush1.bf16.msra.mxu0 %v3825_v16  ;;  %v3322_v16 = vld [vmem:[%s3770_s5 + $0x218] ss:$12 sps:$4 sm:$0xff]  }
  0x91   : > { %1276 = vmatprep.subr.bf16.mxu0 %v3849_v22  ;;  %v3279_v22 = vld [vmem:[%s3770_s5 + $0x124] ss:$12 sps:$4 sm:$0xff]  }
  0x94   : > { %1277 = vmatpush1.bf16.msra.mxu0 %v3844_v21  ;;  %v3272_v21 = vld [vmem:[%s3770_s5 + $0x108] ss:$12 sps:$4 sm:$0xff]  }
  0x95   : > { %1278 = vmatprep.subr.bf16.mxu0 %v3870_v27  ;;  %1467 = vmatmul.mubr.bf16.gmra.mrb[16].mxu1 %v3298_v62  ;;  %v3287_v27 = vld [vmem:[%s3770_s5 + $0x154] ss:$12 sps:$4 sm:$0xff]  }
  0x96   : > { %1476 = vmatprep.mubr.bf16.mxu1 %v3584_v20 }
  0x97   : > { %1036 = vmatmul.mubr.bf16.gmra.mrb[4].mxu0 %v3224_v54 }
  0x98   : > { %1045 = vmatprep.mubr.bf16.mxu0 %v3228_v55  ;;  %1279 = vmatpush1.bf16.msra.mxu0 %v3865_v26  ;;  %v3285_v26 = vld [vmem:[%s3770_s5 + $0x138] ss:$12 sps:$4 sm:$0xff]  }
  0x99   : > { %1280 = vmatprep.subr.bf16.mxu0 %v3883_v30  ;;  %v3293_v30 = vld [vmem:[%s3770_s5 + $0x168] ss:$12 sps:$4 sm:$0xff]  }
  0x9c   : > { %1281 = vmatpush1.bf16.msra.mxu0 %v3888_v31  ;;  %v3295_v31 = vld [vmem:[%s3770_s5 + $0x184] ss:$12 sps:$4 sm:$0xff]  }
  0x9d   : > { %1282 = vmatprep.subr.bf16.mxu0 %v3264_v33  ;;  %1477 = vmatmul.mubr.bf16.gmra.mrb[20].mxu1 %v3302_v1  ;;  %v3299_v33 = vld [vmem:[%s3770_s5 + $0x19c] ss:$12 sps:$4 sm:$0xff]  }
  0x9e   : > { %1486 = vmatprep.mubr.bf16.mxu1 %v3584_v20 }
  0x9f   : > { %1046 = vmatmul.mubr.bf16.gmra.mrb[8].mxu0 %v3230_v57 }
  0xa0   : > { %1055 = vmatprep.mubr.bf16.mxu0 %v3231_v58  ;;  %1283 = vmatpush1.bf16.msra.mxu0 %v3901_v34  ;;  %v3301_v34 = vld [vmem:[%s3770_s5 + $0x198] ss:$12 sps:$4 sm:$0xff]  }
  0xa1   : > { %1284 = vmatprep.subr.bf16.mxu0 %v3909_v36  ;;  %v3305_v36 = vld [vmem:[%s3770_s5 + $0x1b0] ss:$12 sps:$4 sm:$0xff]  }
  0xa4   : > { %1285 = vmatpush1.bf16.msra.mxu0 %v3918_v38  ;;  %v3309_v38 = vld [vmem:[%s3770_s5 + $0x1c8] ss:$12 sps:$4 sm:$0xff]  }
  0xa5   : > { %1286 = vmatprep.subr.bf16.mxu0 %v3273_v40  ;;  %1487 = vmatmul.mubr.bf16.gmra.mrb[24].mxu1 %v3306_v4  ;;  %v3313_v40 = vld [vmem:[%s3770_s5 + $0x1e0] ss:$12 sps:$4 sm:$0xff]  }
  0xa6   : > { %1496 = vmatprep.mubr.bf16.mxu1 %v3584_v20 }
  0xa7   : > { %1056 = vmatmul.mubr.bf16.gmra.mrb[12].mxu0 %v3233_v60 }
  0xa8   : > { %1065 = vmatprep.mubr.bf16.mxu0 %v3234_v61  ;;  %1287 = vmatpush1.bf16.msra.mxu0 %v3275_v42  ;;  %v3317_v42 = vld [vmem:[%s3770_s5 + $0x1f8] ss:$12 sps:$4 sm:$0xff]   ;;  %v3333_v61 = vld [vmem:[%s3770_s5 + $0x50] ss:$12 sps:$4 sm:$0xff]  }
  0xa9   : > { %1288 = vmatprep.subr.bf16.mxu0 %v3276_v44  ;;  %v3321_v44 = vld [vmem:[%s3770_s5 + $0x210] ss:$12 sps:$4 sm:$0xff]  }
  0xac   : > { %1289 = vmatpush1.bf16.msra.mxu0 %v3278_v46  ;;  %v308_v46 = vld [vmem:[%s3770_s5 + $0x240] sm:$0xff] }
  0xad   : > { %1497 = vmatmul.mubr.bf16.gmra.mrb[28].mxu1 %v3310_v7  ;;  %v2706_v48 = vcombine.high %v308_v46, %v308_v46  ;;  %v2705_v49 = vcombine.low %v308_v46, %v308_v46  ;;  %v3335_v7 = vld [vmem:[%s3770_s5 + $0x80] ss:$12 sps:$4 sm:$0xff]  }
  0xae   : > { %1506 = vmatprep.mubr.bf16.mxu1 %v3584_v20 }
  0xaf   : > { %1066 = vmatmul.mubr.bf16.gmra.mrb[16].mxu0 %v3236_v63 }
  0xb0   : > { %1075 = vmatprep.mubr.bf16.mxu0 %v3240_v0 }
  0xb5   : > { %1507 = vmatmul.mubr.bf16.gmra.mrb[32].mxu1 %v3314_v10 }
  0xb6   : > { %1516 = vmatprep.mubr.bf16.mxu1 %v3584_v20 }
  0xb7   : > { %1076 = vmatmul.mubr.bf16.gmra.mrb[20].mxu0 %v3242_v2  ;;  %v3334_v2 = vld [vmem:[%s3770_s5 + $0x68] ss:$12 sps:$4 sm:$0xff]  }
  0xb8   : > { %1085 = vmatprep.mubr.bf16.mxu0 %v3243_v3 }
  0xbd   : > { %1517 = vmatmul.mubr.bf16.gmra.mrb[36].mxu1 %v3318_v13 }
  0xbe   : > { %1526 = vmatprep.mubr.bf16.mxu1 %v3584_v20 }
  0xbf   : > { %1086 = vmatmul.mubr.bf16.gmra.mrb[24].mxu0 %v3245_v5 }
  0xc0   : > { %1095 = vmatprep.mubr.bf16.mxu0 %v3246_v6 }
  0xc5   : > { %1527 = vmatmul.mubr.bf16.gmra.mrb[40].mxu1 %v3322_v16 }
  0xc6   : > { %1536 = vmatprep.mubr.bf16.mxu1 %v3584_v20 }
  0xc7   : > { %1096 = vmatmul.mubr.bf16.gmra.mrb[28].mxu0 %v3248_v8 }
  0xc8   : > { %1105 = vmatprep.mubr.bf16.mxu0 %v3252_v9 }
  0xcd   : > { %1537 = vmatmul.mubr.bf16.gmra.mrb[44].mxu1 %v3326_v19 }
  0xce   : > { %1546 = vmatprep.mubr.bf16.mxu1 %v3584_v20 }
  0xcf   : > { %1106 = vmatmul.mubr.bf16.gmra.mrb[32].mxu0 %v3254_v11 }
  0xd0   : > { %1115 = vmatprep.mubr.bf16.mxu0 %v3255_v12  ;;  %v3336_v12 = vld [vmem:[%s3770_s5 + $0x98] ss:$12 sps:$4 sm:$0xff]  }
  0xd5   : > { %1547 = vmatmul.mubr.bf16.gmra.mrb[48].mxu1 %v3329_v23  ;;  %v3338_v23 = vld [vmem:[%s3770_s5 + $0xc8] ss:$12 sps:$4 sm:$0xff]  }
  0xd7   : > { %1116 = vmatmul.mubr.bf16.gmra.mrb[36].mxu0 %v3257_v14 }
  0xd8   : > { %1125 = vmatprep.mubr.bf16.mxu0 %v3261_v15 }
  0xdf   : > { %1126 = vmatmul.mubr.bf16.gmra.mrb[40].mxu0 %v3263_v17  ;;  %v3337_v17 = vld [vmem:[%s3770_s5 + $0xb0] ss:$12 sps:$4 sm:$0xff]  }
  0xe0   : > { %1135 = vmatprep.mubr.bf16.mxu0 %v3270_v18 }
  0xe7   : > { %1136 = vmatmul.mubr.bf16.gmra.mrb[44].mxu0 %v3272_v21 }
  0xe8   : > { %1145 = vmatprep.mubr.bf16.mxu0 %v3279_v22 }
  0xef   : > { %1146 = vmatmul.mubr.bf16.gmra.mrb[48].mxu0 %v3281_v24 }
  0xf0   : > { %1155 = vmatprep.mubr.bf16.mxu0 %v3283_v25 }
  0xf7   : > { %1156 = vmatmul.mubr.bf16.gmra.mrb[52].mxu0 %v3285_v26 }
  0xf8   : > { %1165 = vmatprep.mubr.bf16.mxu0 %v3287_v27 }
  0xff   : > { %1166 = vmatmul.mubr.bf16.gmra.mrb[56].mxu0 %v3289_v28  ;;  %v3339_v28 = vld [vmem:[%s3770_s5 + $0xe0] ss:$12 sps:$4 sm:$0xff]  }
 0x100   : > { %1175 = vmatprep.mubr.bf16.mxu0 %v3291_v29 }
 0x107   : > { %1176 = vmatmul.mubr.bf16.gmra.mrb[60].mxu0 %v3293_v30 }
 0x108   : > { %1185 = vmatprep.mubr.bf16.mxu0 %v3295_v31 }
 0x10f   : > { %1186 = vmatmul.mubr.bf16.gmra.mrb[64].mxu0 %v3297_v32 }
 0x110   : > { %1195 = vmatprep.mubr.bf16.mxu0 %v3299_v33  ;;  %v3340_v33 = vld [vmem:[%s3770_s5 + $0xf8] ss:$12 sps:$4 sm:$0xff]  }
 0x117   : > { %1196 = vmatmul.mubr.bf16.gmra.mrb[68].mxu0 %v3301_v34 }
 0x118   : > { %1205 = vmatprep.mubr.bf16.mxu0 %v3303_v35 }
 0x11f   : > { %1206 = vmatmul.mubr.bf16.gmra.mrb[72].mxu0 %v3305_v36 }
 0x120   : > { %1215 = vmatprep.mubr.bf16.mxu0 %v3307_v37 }
 0x127   : > { %1216 = vmatmul.mubr.bf16.gmra.mrb[76].mxu0 %v3309_v38  ;;  %v3341_v38 = vld [vmem:[%s3770_s5 + $0x110] ss:$12 sps:$4 sm:$0xff]   ;;  %s4715_s5 = scalar_lea.hbm %s4791_s3, %s2855_s6 }
 0x128   : > { %1225 = vmatprep.mubr.bf16.mxu0 %v3311_v39 }
 0x12f   : > { %1226 = vmatmul.mubr.bf16.gmra.mrb[80].mxu0 %v3313_v40 }
 0x130   : > { %1235 = vmatprep.mubr.bf16.mxu0 %v3315_v41 }
 0x137   : > { %1236 = vmatmul.mubr.bf16.gmra.mrb[84].mxu0 %v3317_v42 }
 0x138   : > { %1245 = vmatprep.mubr.bf16.mxu0 %v3319_v43 }
 0x13f   : > { %1246 = vmatmul.mubr.bf16.gmra.mrb[88].mxu0 %v3321_v44 }
 0x140   : > { %1255 = vmatprep.mubr.bf16.mxu0 %v3323_v45 }
 0x147   : > { %1256 = vmatmul.mubr.bf16.gmra.mrb[92].mxu0 %v3325_v47 }
 0x148   : > { %1265 = vmatprep.mubr.bf16.mxu0 %v2706_v48  ;;  %v4043_v52 = vpop.f32.mrb[0].mxu1 }
 0x149   : > { %v4045_v53 = vpop.f32.mrb[1].mxu1 }
 0x14a   : > { %v4047_v54 = vpop.f32.mrb[2].mxu1 }
 0x14b   : > { %v4050_v55 = vpop.f32.mrb[3].mxu1 }
 0x14f   : > { %1266 = vmatmul.mubr.bf16.gmra.mrb[96].mxu0 %v2705_v49 }
 0x150   : > { %1306 = vmatprep.mubr.bf16.mxu0 %v3584_v20  ;;  %v4053_v57 = vpop.f32.mrb[4].mxu1 }
 0x151   : > { %v4055_v58 = vpop.f32.mrb[5].mxu1 }
 0x152   : > { %v4057_v59 = vpop.f32.mrb[6].mxu1 }
 0x153   : > { %v4060_v60 = vpop.f32.mrb[7].mxu1 }
 0x157   : > { %1307 = vmatmul.mubr.bf16.vlgmr.msra.gmra.mrb[0].mxu0 %v3330_v50 }
 0x158   : > { %1316 = vmatprep.mubr.bf16.mxu0 %v3584_v20  ;;  %v4063_v62 = vpop.f32.mrb[8].mxu1 }
 0x159   : > { %v4065_v63 = vpop.f32.mrb[9].mxu1 }
 0x15a   : > { %v4067_v0 = vpop.f32.mrb[10].mxu1 }
 0x15b   : > { %v4070_v1 = vpop.f32.mrb[11].mxu1 }
 0x15f   : > { %1317 = vmatmul.mubr.bf16.gmra.mrb[4].mxu0 %v3331_v51 }
 0x160   : > { %1326 = vmatprep.mubr.bf16.mxu0 %v3584_v20  ;;  %v4073_v3 = vpop.f32.mrb[12].mxu1 }
 0x161   : > { %v4075_v4 = vpop.f32.mrb[13].mxu1 }
 0x162   : > { %v4077_v5 = vpop.f32.mrb[14].mxu1 }
 0x163   : > { %v4080_v6 = vpop.f32.mrb[15].mxu1 }
 0x167   : > { %1327 = vmatmul.mubr.bf16.gmra.mrb[8].mxu0 %v3332_v56 }
 0x168   : > { %1336 = vmatprep.mubr.bf16.mxu0 %v3584_v20  ;;  %v4083_v8 = vpop.f32.mrb[16].mxu1 }
 0x169   : > { %v4085_v9 = vpop.f32.mrb[17].mxu1 }
 0x16a   : > { %v4087_v10 = vpop.f32.mrb[18].mxu1 }
 0x16b   : > { %v4090_v11 = vpop.f32.mrb[19].mxu1 }
 0x16f   : > { %1337 = vmatmul.mubr.bf16.gmra.mrb[12].mxu0 %v3333_v61 }
 0x170   : > { %1346 = vmatprep.mubr.bf16.mxu0 %v3584_v20  ;;  %v4093_v13 = vpop.f32.mrb[20].mxu1 }
 0x171   : > { %v4095_v14 = vpop.f32.mrb[21].mxu1 }
 0x172   : > { %v4097_v15 = vpop.f32.mrb[22].mxu1 }
 0x173   : > { %v4100_v16 = vpop.f32.mrb[23].mxu1 }
 0x177   : > { %1347 = vmatmul.mubr.bf16.gmra.mrb[16].mxu0 %v3334_v2 }
 0x178   : > { %1356 = vmatprep.mubr.bf16.mxu0 %v3584_v20  ;;  %v4103_v18 = vpop.f32.mrb[24].mxu1 }
 0x179   : > { %v4105_v19 = vpop.f32.mrb[25].mxu1 }
 0x17a   : > { %v4107_v21 = vpop.f32.mrb[26].mxu1 }
 0x17b   : > { %v4110_v22 = vpop.f32.mrb[27].mxu1 }
 0x17f   : > { %1357 = vmatmul.mubr.bf16.gmra.mrb[20].mxu0 %v3335_v7 }
 0x180   : > { %1366 = vmatprep.mubr.bf16.mxu0 %v3584_v20  ;;  %v4113_v24 = vpop.f32.mrb[28].mxu1 }
 0x181   : > { %v4115_v25 = vpop.f32.mrb[29].mxu1 }
 0x182   : > { %v4117_v26 = vpop.f32.mrb[30].mxu1 }
 0x183   : > { %v4120_v27 = vpop.f32.mrb[31].mxu1 }
 0x187   : > { %1367 = vmatmul.mubr.bf16.gmra.mrb[24].mxu0 %v3336_v12 }
 0x188   : > { %1376 = vmatprep.mubr.bf16.mxu0 %v3584_v20  ;;  %v4123_v29 = vpop.f32.mrb[32].mxu1 }
 0x189   : > { %v4125_v30 = vpop.f32.mrb[33].mxu1 }
 0x18a   : > { %v4127_v31 = vpop.f32.mrb[34].mxu1 }
 0x18b   : > { %v4130_v32 = vpop.f32.mrb[35].mxu1 }
 0x18f   : > { %1377 = vmatmul.mubr.bf16.gmra.mrb[28].mxu0 %v3337_v17 }
 0x190   : > { %1386 = vmatprep.mubr.bf16.mxu0 %v3584_v20  ;;  %v4133_v34 = vpop.f32.mrb[36].mxu1 }
 0x191   : > { %v4135_v35 = vpop.f32.mrb[37].mxu1 }
 0x192   : > { %v4137_v36 = vpop.f32.mrb[38].mxu1 }
 0x193   : > { %v4140_v37 = vpop.f32.mrb[39].mxu1 }
 0x197   : > { %1387 = vmatmul.mubr.bf16.gmra.mrb[32].mxu0 %v3338_v23 }
 0x198   : > { %1396 = vmatprep.mubr.bf16.mxu0 %v3584_v20  ;;  %v4143_v39 = vpop.f32.mrb[40].mxu1 }
 0x199   : > { %v4145_v40 = vpop.f32.mrb[41].mxu1 }
 0x19a   : > { %v4147_v41 = vpop.f32.mrb[42].mxu1 }
 0x19b   : > { %v4149_v42 = vpop.f32.mrb[43].mxu1 }
 0x19f   : > { %1397 = vmatmul.mubr.bf16.gmra.mrb[36].mxu0 %v3339_v28 }
 0x1a0   : > { %1406 = vmatprep.mubr.bf16.mxu0 %v3584_v20  ;;  %v4151_v43 = vpop.f32.mrb[44].mxu1 }
 0x1a1   : > { %v4153_v44 = vpop.f32.mrb[45].mxu1 }
 0x1a2   : > { %v4155_v45 = vpop.f32.mrb[46].mxu1 }
 0x1a3   : > { %v4157_v46 = vpop.f32.mrb[47].mxu1 }
 0x1a7   : > { %1407 = vmatmul.mubr.bf16.gmra.mrb[40].mxu0 %v3340_v33 }
 0x1a8   : > { %1416 = vmatprep.mubr.bf16.mxu0 %v3584_v20  ;;  %v4159_v20 = vpop.f32.mrb[48].mxu1 }
 0x1a9   : > { %v4161_v47 = vpop.f32.mrb[49].mxu1 }
 0x1aa   : > { %v1552_v48 = vpop.f32.mrb[50].mxu1 }
 0x1ab   : > { %v1553_v49 = vpop.f32.mrb[51].mxu1 }
 0x1af   : > { %1417 = vmatmul.mubr.bf16.gmra.mrb[44].mxu0 %v3341_v38 }
 0x1c2   : > { %v1147_v50 = vpop.f32.mrb[48].mxu0 }
 0x1c3   : > { %v4164_v51 = vadd.f32 %v4043_v52, %v1147_v50  ;;  %v1149_v56 = vpop.f32.mrb[49].mxu0 }
 0x1c4   : > { %v4167_v61 = vadd.f32 %v4045_v53, %v1149_v56  ;;  %v1151_v2 = vpop.f32.mrb[50].mxu0 }
 0x1c5   : > { %v4170_v7 = vadd.f32 %v4047_v54, %v1151_v2  ;;  %v1153_v12 = vpop.f32.mrb[51].mxu0 }
 0x1c6   : > { %v4173_v17 = vadd.f32 %v4050_v55, %v1153_v12 }
 0x1ca   : > { %v1157_v52 = vpop.f32.mrb[52].mxu0 }
 0x1cb   : > { %v4180_v33 = vadd.f32 %v4053_v57, %v1157_v52  ;;  %v1159_v53 = vpop.f32.mrb[53].mxu0 }
 0x1cc   : > { %v4183_v38 = vadd.f32 %v4055_v58, %v1159_v53  ;;  %v1161_v54 = vpop.f32.mrb[54].mxu0 }
 0x1cd   : > { %v4186_v48 = vadd.f32 %v4057_v59, %v1161_v54  ;;  %v1163_v55 = vpop.f32.mrb[55].mxu0 }
 0x1ce   : > { %v4189_v49 = vadd.f32 %v4060_v60, %v1163_v55 }
 0x1d2   : > { %v1167_v57 = vpop.f32.mrb[56].mxu0 }
 0x1d3   : > { %v4196_v2 = vadd.f32 %v4063_v62, %v1167_v57  ;;  %v1169_v58 = vpop.f32.mrb[57].mxu0 }
 0x1d4   : > { %v4199_v12 = vadd.f32 %v4065_v63, %v1169_v58  ;;  %v1171_v59 = vpop.f32.mrb[58].mxu0 }
 0x1d5   : > { %v4202_v52 = vadd.f32 %v4067_v0, %v1171_v59  ;;  %v1173_v60 = vpop.f32.mrb[59].mxu0 }
 0x1d6   : > { %v4205_v53 = vadd.f32 %v4070_v1, %v1173_v60 }
 0x1da   : > { %v1177_v62 = vpop.f32.mrb[60].mxu0 }
 0x1db   : > { %v4212_v57 = vadd.f32 %v4073_v3, %v1177_v62  ;;  %v1179_v63 = vpop.f32.mrb[61].mxu0 }
 0x1dc   : > { %v4215_v58 = vadd.f32 %v4075_v4, %v1179_v63  ;;  %v1181_v0 = vpop.f32.mrb[62].mxu0 }
 0x1dd   : > { %v4218_v59 = vadd.f32 %v4077_v5, %v1181_v0  ;;  %v1183_v1 = vpop.f32.mrb[63].mxu0 }
 0x1de   : > { %v4221_v60 = vadd.f32 %v4080_v6, %v1183_v1 }
 0x1e2   : > { %v1187_v3 = vpop.f32.mrb[64].mxu0 }
 0x1e3   : > { %v4228_v62 = vadd.f32 %v4083_v8, %v1187_v3  ;;  %v1189_v4 = vpop.f32.mrb[65].mxu0 }
 0x1e4   : > { %v4231_v63 = vadd.f32 %v4085_v9, %v1189_v4  ;;  %v1191_v5 = vpop.f32.mrb[66].mxu0 }
 0x1e5   : > { %v4234_v0 = vadd.f32 %v4087_v10, %v1191_v5  ;;  %v1193_v6 = vpop.f32.mrb[67].mxu0 }
 0x1e6   : > { %v4237_v1 = vadd.f32 %v4090_v11, %v1193_v6 }
 0x1ea   : > { %v1197_v8 = vpop.f32.mrb[68].mxu0 }
 0x1eb   : > { %v4244_v3 = vadd.f32 %v4093_v13, %v1197_v8  ;;  %v1199_v9 = vpop.f32.mrb[69].mxu0 }
 0x1ec   : > { %v4247_v4 = vadd.f32 %v4095_v14, %v1199_v9  ;;  %v1201_v10 = vpop.f32.mrb[70].mxu0 }
 0x1ed   : > { %v4250_v5 = vadd.f32 %v4097_v15, %v1201_v10  ;;  %v1203_v11 = vpop.f32.mrb[71].mxu0 }
 0x1ee   : > { %v4253_v6 = vadd.f32 %v4100_v16, %v1203_v11 }
 0x1f2   : > { %v1207_v13 = vpop.f32.mrb[72].mxu0 }
 0x1f3   : > { %v4260_v8 = vadd.f32 %v4103_v18, %v1207_v13  ;;  %v1209_v14 = vpop.f32.mrb[73].mxu0 }
 0x1f4   : > { %v4263_v9 = vadd.f32 %v4105_v19, %v1209_v14  ;;  %v1211_v15 = vpop.f32.mrb[74].mxu0 }
 0x1f5   : > { %v4266_v10 = vadd.f32 %v4107_v21, %v1211_v15  ;;  %v1213_v16 = vpop.f32.mrb[75].mxu0 }
 0x1f6   : > { %v4269_v11 = vadd.f32 %v4110_v22, %v1213_v16 }
 0x1fa   : > { %v1217_v18 = vpop.f32.mrb[76].mxu0 }
 0x1fb   : > { %v4276_v13 = vadd.f32 %v4113_v24, %v1217_v18  ;;  %v1219_v19 = vpop.f32.mrb[77].mxu0 }
 0x1fc   : > { %v4279_v14 = vadd.f32 %v4115_v25, %v1219_v19  ;;  %v1221_v21 = vpop.f32.mrb[78].mxu0 }
 0x1fd   : > { %v4282_v15 = vadd.f32 %v4117_v26, %v1221_v21  ;;  %v1223_v22 = vpop.f32.mrb[79].mxu0 }
 0x1fe   : > { %v4285_v16 = vadd.f32 %v4120_v27, %v1223_v22 }
 0x202   : > { %v1227_v24 = vpop.f32.mrb[80].mxu0 }
 0x203   : > { %v4292_v18 = vadd.f32 %v4123_v29, %v1227_v24  ;;  %v1229_v25 = vpop.f32.mrb[81].mxu0 }
 0x204   : > { %v4295_v19 = vadd.f32 %v4125_v30, %v1229_v25  ;;  %v1231_v26 = vpop.f32.mrb[82].mxu0 }
 0x205   : > { %v4298_v21 = vadd.f32 %v4127_v31, %v1231_v26  ;;  %v1233_v27 = vpop.f32.mrb[83].mxu0 }
 0x206   : > { %v4301_v22 = vadd.f32 %v4130_v32, %v1233_v27 }
 0x20a   : > { %v1237_v29 = vpop.f32.mrb[84].mxu0 }
 0x20b   : > { %v4308_v24 = vadd.f32 %v4133_v34, %v1237_v29  ;;  %v1239_v30 = vpop.f32.mrb[85].mxu0 }
 0x20c   : > { %v4311_v25 = vadd.f32 %v4135_v35, %v1239_v30  ;;  %v1241_v31 = vpop.f32.mrb[86].mxu0 }
 0x20d   : > { %v4314_v26 = vadd.f32 %v4137_v36, %v1241_v31  ;;  %v1243_v32 = vpop.f32.mrb[87].mxu0 }
 0x20e   : > { %v4317_v27 = vadd.f32 %v4140_v37, %v1243_v32 }
 0x212   : > { %v1247_v34 = vpop.f32.mrb[88].mxu0 }
 0x213   : > { %v4324_v29 = vadd.f32 %v4143_v39, %v1247_v34  ;;  %v1249_v35 = vpop.f32.mrb[89].mxu0  ;;  %v3344_v39 = vld [vmem:[%s4790_s2 + $0x4] ss:$16 sps:$4 sm:$0xff]  }
 0x214   : > { %v4327_v30 = vadd.f32 %v4145_v40, %v1249_v35  ;;  %v1251_v36 = vpop.f32.mrb[90].mxu0  ;;  %2009 = vmatprep.mubr.bf16.mxu1 %v3344_v39 }
 0x215   : > { %v4330_v31 = vadd.f32 %v4147_v41, %v1251_v36  ;;  %v1253_v37 = vpop.f32.mrb[91].mxu0 }
 0x216   : > { %v4333_v32 = vadd.f32 %v4149_v42, %v1253_v37 }
 0x21a   : > { %v1257_v40 = vpop.f32.mrb[92].mxu0 }
 0x21b   : > { %v4343_v34 = vadd.f32 %v4151_v43, %v1257_v40  ;;  %v1259_v41 = vpop.f32.mrb[93].mxu0 }
 0x21c   : > { %v4346_v35 = vadd.f32 %v4153_v44, %v1259_v41  ;;  %v1261_v42 = vpop.f32.mrb[94].mxu0 }
 0x21d   : > { %4808 = vst [vmem:[#allocation12_spill] sm:$0xff] %v4343_v34  ;;  %v4349_v36 = vadd.f32 %v4155_v45, %v1261_v42  ;;  %v1263_v37 = vpop.f32.mrb[95].mxu0 }
 0x21e   : > { %v4352_v54 = vadd.f32 %v4157_v46, %v1263_v37 }
 0x21f   : > { %4809 = vst [vmem:[#allocation13_spill] sm:$0xff] %v4349_v36 }
 0x222   : > { %v1267_v40 = vpop.f32.mrb[96].mxu0 }
 0x223   : > { %v4359_v39 = vadd.f32 %v4159_v20, %v1267_v40  ;;  %v1269_v44 = vpop.f32.mrb[97].mxu0 }
 0x224   : > { %v4362_v41 = vadd.f32 %v4161_v47, %v1269_v44  ;;  %v1271_v45 = vpop.f32.mrb[98].mxu0 }
 0x225   : > { %4810 = vst [vmem:[#allocation14_spill] sm:$0xff] %v4359_v39  ;;  %v1272_v42 = vpop.f32.mrb[99].mxu0 }
 0x226   : > { %4811 = vst [vmem:[#allocation15_spill] sm:$0xff] %v4362_v41 }
 0x22a   : > { %v1308_v50 = vpop.f32.mrb[0].mxu0 }
 0x22b   : > { %v1310_v56 = vpop.f32.mrb[1].mxu0 }
 0x22c   : > { %v1312_v46 = vpop.f32.mrb[2].mxu0 }
 0x22d   : > { %v1555_v37 = vpack.c.bf16 %v1312_v46, %v1308_v50  ;;  %v1314_v23 = vpop.f32.mrb[3].mxu0 }
 0x22e   : > { %v1556_v28 = vpack.c.bf16 %v1314_v23, %v1310_v56 }
 0x230   : > { %1977 = vmatprep.subr.bf16.mxu1 %v1556_v28 }
 0x231   : > { %1978 = vmatpush1.bf16.msra.mxu1 %v1555_v37 }
 0x232   : > { %v1318_v55 = vpop.f32.mrb[4].mxu0 }
 0x233   : > { %v1320_v43 = vpop.f32.mrb[5].mxu0 }
 0x234   : > { %v1322_v34 = vpop.f32.mrb[6].mxu0 }
 0x235   : > { %v1557_v36 = vpack.c.bf16 %v1322_v34, %v1318_v55  ;;  %v1324_v20 = vpop.f32.mrb[7].mxu0 }
 0x236   : > { %v1558_v40 = vpack.c.bf16 %v1324_v20, %v1320_v43 }
 0x238   : > { %1979 = vmatprep.subr.bf16.mxu1 %v1558_v40 }
 0x239   : > { %1980 = vmatpush1.bf16.msra.mxu1 %v1557_v36 }
 0x23a   : > { %v1328_v47 = vpop.f32.mrb[8].mxu0 }
 0x23b   : > { %v1330_v44 = vpop.f32.mrb[9].mxu0 }
 0x23c   : > { %v1332_v45 = vpop.f32.mrb[10].mxu0 }
 0x23d   : > { %v1559_v42 = vpack.c.bf16 %v1332_v45, %v1328_v47  ;;  %v1334_v41 = vpop.f32.mrb[11].mxu0 }
 0x23e   : > { %v1560_v39 = vpack.c.bf16 %v1334_v41, %v1330_v44 }
 0x240   : > { %1981 = vmatprep.subr.bf16.mxu1 %v1560_v39 }
 0x241   : > { %1982 = vmatpush1.bf16.msra.mxu1 %v1559_v42 }
 0x242   : > { %v1338_v50 = vpop.f32.mrb[12].mxu0 }
 0x243   : > { %v1340_v23 = vpop.f32.mrb[13].mxu0 }
 0x244   : > { %v1342_v28 = vpop.f32.mrb[14].mxu0 }
 0x245   : > { %v1561_v56 = vpack.c.bf16 %v1342_v28, %v1338_v50  ;;  %v1344_v46 = vpop.f32.mrb[15].mxu0 }
 0x246   : > { %v1562_v37 = vpack.c.bf16 %v1344_v46, %v1340_v23 }
 0x248   : > { %1983 = vmatprep.subr.bf16.mxu1 %v1562_v37 }
 0x249   : > { %1984 = vmatpush1.bf16.msra.mxu1 %v1561_v56 }
 0x24a   : > { %v1348_v55 = vpop.f32.mrb[16].mxu0 }
 0x24b   : > { %v1350_v34 = vpop.f32.mrb[17].mxu0 }
 0x24c   : > { %v1352_v43 = vpop.f32.mrb[18].mxu0 }
 0x24d   : > { %v1563_v36 = vpack.c.bf16 %v1352_v43, %v1348_v55  ;;  %v1354_v20 = vpop.f32.mrb[19].mxu0 }
 0x24e   : > { %v1564_v40 = vpack.c.bf16 %v1354_v20, %v1350_v34 }
 0x250   : > { %1985 = vmatprep.subr.bf16.mxu1 %v1564_v40 }
 0x251   : > { %1986 = vmatpush1.bf16.msra.mxu1 %v1563_v36 }
 0x252   : > { %v1358_v47 = vpop.f32.mrb[20].mxu0 }
 0x253   : > { %v1360_v41 = vpop.f32.mrb[21].mxu0 }
 0x254   : > { %v1362_v39 = vpop.f32.mrb[22].mxu0 }
 0x255   : > { %v1565_v44 = vpack.c.bf16 %v1362_v39, %v1358_v47  ;;  %v1364_v45 = vpop.f32.mrb[23].mxu0 }
 0x256   : > { %v1566_v42 = vpack.c.bf16 %v1364_v45, %v1360_v41 }
 0x258   : > { %1987 = vmatprep.subr.bf16.mxu1 %v1566_v42 }
 0x259   : > { %1988 = vmatpush1.bf16.msra.mxu1 %v1565_v44 }
 0x25a   : > { %v1368_v50 = vpop.f32.mrb[24].mxu0 }
 0x25b   : > { %v1370_v23 = vpop.f32.mrb[25].mxu0 }
 0x25c   : > { %v1372_v28 = vpop.f32.mrb[26].mxu0 }
 0x25d   : > { %v1567_v56 = vpack.c.bf16 %v1372_v28, %v1368_v50  ;;  %v1374_v46 = vpop.f32.mrb[27].mxu0 }
 0x25e   : > { %v1568_v37 = vpack.c.bf16 %v1374_v46, %v1370_v23 }
 0x260   : > { %1989 = vmatprep.subr.bf16.mxu1 %v1568_v37 }
 0x261   : > { %1990 = vmatpush1.bf16.msra.mxu1 %v1567_v56 }
 0x262   : > { %v1378_v55 = vpop.f32.mrb[28].mxu0 }
 0x263   : > { %v1380_v34 = vpop.f32.mrb[29].mxu0 }
 0x264   : > { %v1382_v43 = vpop.f32.mrb[30].mxu0 }
 0x265   : > { %v1569_v36 = vpack.c.bf16 %v1382_v43, %v1378_v55  ;;  %v1384_v20 = vpop.f32.mrb[31].mxu0 }
 0x266   : > { %v1570_v40 = vpack.c.bf16 %v1384_v20, %v1380_v34 }
 0x268   : > { %1991 = vmatprep.subr.bf16.mxu1 %v1570_v40 }
 0x269   : > { %1992 = vmatpush1.bf16.msra.mxu1 %v1569_v36 }
 0x26a   : > { %v1388_v47 = vpop.f32.mrb[32].mxu0 }
 0x26b   : > { %v1390_v41 = vpop.f32.mrb[33].mxu0 }
 0x26c   : > { %v1392_v39 = vpop.f32.mrb[34].mxu0 }
 0x26d   : > { %v1571_v44 = vpack.c.bf16 %v1392_v39, %v1388_v47  ;;  %v1394_v45 = vpop.f32.mrb[35].mxu0 }
 0x26e   : > { %v1572_v42 = vpack.c.bf16 %v1394_v45, %v1390_v41 }
 0x270   : > { %1993 = vmatprep.subr.bf16.mxu1 %v1572_v42 }
 0x271   : > { %1994 = vmatpush1.bf16.msra.mxu1 %v1571_v44 }
 0x272   : > { %v1398_v50 = vpop.f32.mrb[36].mxu0 }
 0x273   : > { %v1400_v23 = vpop.f32.mrb[37].mxu0 }
 0x274   : > { %v1402_v28 = vpop.f32.mrb[38].mxu0 }
 0x275   : > { %v1573_v56 = vpack.c.bf16 %v1402_v28, %v1398_v50  ;;  %v1404_v46 = vpop.f32.mrb[39].mxu0  ;;  %v4812_v50 = vpack.c.bf16 %v4173_v17, %v4167_v61  ;;  %v4814_v28 = vpack.c.bf16 %v4189_v49, %v4183_v38  ;;  %v4817_v61 = vpack.c.bf16 %v4202_v52, %v4196_v2  ;;  %v3347_v2 = vld [vmem:[%s4790_s2 + $0x20] ss:$16 sps:$4 sm:$0xff]   ;;  %v3348_v52 = vld [vmem:[%s4790_s2 + $0x44] ss:$16 sps:$4 sm:$0xff]  }
 0x276   : > { %v1574_v37 = vpack.c.bf16 %v1404_v46, %v1400_v23  ;;  %v4813_v23 = vpack.c.bf16 %v4170_v7, %v4164_v51  ;;  %v4816_v46 = vpack.c.bf16 %v4205_v53, %v4199_v12  ;;  %v4818_v51 = vpack.c.bf16 %v4221_v60, %v4215_v58  ;;  %v3342_v7 = vld [vmem:[%s4790_s2] ss:$16 sps:$4 sm:$0xff]  }
 0x277   : > { %v4819_v17 = vpack.c.bf16 %v4218_v59, %v4212_v57  ;;  %v4820_v38 = vpack.c.bf16 %v4237_v1, %v4231_v63  ;;  %v4822_v49 = vpack.c.bf16 %v4253_v6, %v4247_v4  ;;  %v4823_v12 = vpack.c.bf16 %v4250_v5, %v4244_v3  ;;  %v3350_v59 = vld [vmem:[%s4790_s2 + $0x40] ss:$16 sps:$4 sm:$0xff]   ;;  %v3354_v5 = vld [vmem:[%s4790_s2 + $0x84] ss:$16 sps:$4 sm:$0xff]  }
 0x278   : > { %1995 = vmatprep.subr.bf16.mxu1 %v1574_v37  ;;  %v4824_v53 = vpack.c.bf16 %v4269_v11, %v4263_v9  ;;  %v4825_v57 = vpack.c.bf16 %v4266_v10, %v4260_v8  ;;  %v4826_v58 = vpack.c.bf16 %v4285_v16, %v4279_v14  ;;  %v4827_v60 = vpack.c.bf16 %v4282_v15, %v4276_v13  ;;  %v3353_v3 = vld [vmem:[%s4790_s2 + $0x60] ss:$16 sps:$4 sm:$0xff]   ;;  %v4835_v10 = vld [vmem:[#allocation14_spill] sm:$0xff] }
 0x279   : > { %1996 = vmatpush1.bf16.msra.mxu1 %v1573_v56  ;;  %v4815_v56 = vpack.c.bf16 %v4186_v48, %v4180_v33  ;;  %v3345_v33 = vld [vmem:[%s4790_s2 + $0x24] ss:$16 sps:$4 sm:$0xff]   ;;  %v4821_v48 = vpack.c.bf16 %v4234_v0, %v4228_v62  ;;  %v4828_v63 = vpack.c.bf16 %v4301_v22, %v4295_v19  ;;  %v4829_v0 = vpack.c.bf16 %v4298_v21, %v4292_v18  ;;  %v3356_v15 = vld [vmem:[%s4790_s2 + $0x80] ss:$16 sps:$4 sm:$0xff]   ;;  %v4838_v18 = vld [vmem:[#allocation12_spill] sm:$0xff] }
 0x27a   : > { %v1408_v55 = vpop.f32.mrb[40].mxu0  ;;  %v3351_v62 = vld [vmem:[%s4790_s2 + $0x64] ss:$16 sps:$4 sm:$0xff]   ;;  %v4830_v1 = vpack.c.bf16 %v4317_v27, %v4311_v25  ;;  %v4831_v4 = vpack.c.bf16 %v4314_v26, %v4308_v24  ;;  %v4832_v6 = vpack.c.bf16 %v4333_v32, %v4327_v30  ;;  %v4833_v8 = vpack.c.bf16 %v4330_v31, %v4324_v29  ;;  %v3359_v22 = vld [vmem:[%s4790_s2 + $0xa0] ss:$16 sps:$4 sm:$0xff]  }
 0x27b   : > { %v1410_v34 = vpop.f32.mrb[41].mxu0  ;;  %v4834_v9 = vpack.c.bf16 %v4352_v54, %v4346_v35  ;;  %v1603_v11 = vpack.c.bf16 %v4835_v10, %v4835_v10  ;;  %v4836_v13 = vld [vmem:[#allocation15_spill] sm:$0xff]  ;;  %v4837_v16 = vld [vmem:[#allocation13_spill] sm:$0xff] }
 0x27c   : > { %v1412_v43 = vpop.f32.mrb[42].mxu0  ;;  %v1604_v14 = vpack.c.bf16 %v4836_v13, %v4836_v13  ;;  %v4839_v19 = vpack.c.bf16 %v4837_v16, %v4838_v18  ;;  %v3357_v54 = vld [vmem:[%s4790_s2 + $0xa4] ss:$16 sps:$4 sm:$0xff]   ;;  %v3362_v25 = vld [vmem:[%s4790_s2 + $0xc0] ss:$16 sps:$4 sm:$0xff]  }
 0x27d   : > { %v1575_v36 = vpack.c.bf16 %v1412_v43, %v1408_v55  ;;  %v1414_v20 = vpop.f32.mrb[43].mxu0  ;;  %v1972_v21 = vsel %vm1970_vm0, %v1603_v11, 0  ;;  %v3360_v24 = vld [vmem:[%s4790_s2 + $0xc4] ss:$16 sps:$4 sm:$0xff]   ;;  %v3365_v27 = vld [vmem:[%s4790_s2 + $0xe0] ss:$16 sps:$4 sm:$0xff]  }
 0x27e   : > { %v1576_v40 = vpack.c.bf16 %v1414_v20, %v1410_v34  ;;  %v3363_v26 = vld [vmem:[%s4790_s2 + $0xe4] ss:$16 sps:$4 sm:$0xff]   ;;  %v3368_v30 = vld [vmem:[%s4790_s2 + $0x100] ss:$16 sps:$4 sm:$0xff]  }
 0x27f   : > { %v3366_v29 = vld [vmem:[%s4790_s2 + $0x104] ss:$16 sps:$4 sm:$0xff]   ;;  %v3371_v32 = vld [vmem:[%s4790_s2 + $0x120] ss:$16 sps:$4 sm:$0xff]  }
 0x280   : > { %1997 = vmatprep.subr.bf16.mxu1 %v1576_v40  ;;  %v3369_v31 = vld [vmem:[%s4790_s2 + $0x124] ss:$16 sps:$4 sm:$0xff]   ;;  %v3374_v37 = vld [vmem:[%s4790_s2 + $0x140] ss:$16 sps:$4 sm:$0xff]  }
 0x281   : > { %1998 = vmatpush1.bf16.msra.mxu1 %v1575_v36  ;;  %v3372_v35 = vld [vmem:[%s4790_s2 + $0x144] ss:$16 sps:$4 sm:$0xff]   ;;  %v3377_v34 = vld [vmem:[%s4790_s2 + $0x160] ss:$16 sps:$4 sm:$0xff]  }
 0x282   : > { %v1418_v47 = vpop.f32.mrb[44].mxu0  ;;  %v3375_v55 = vld [vmem:[%s4790_s2 + $0x164] ss:$16 sps:$4 sm:$0xff]   ;;  %v3380_v36 = vld [vmem:[%s4790_s2 + $0x180] ss:$16 sps:$4 sm:$0xff]  }
 0x283   : > { %v1420_v41 = vpop.f32.mrb[45].mxu0  ;;  %v3378_v43 = vld [vmem:[%s4790_s2 + $0x184] ss:$16 sps:$4 sm:$0xff]   ;;  %v3383_v40 = vld [vmem:[%s4790_s2 + $0x1a0] ss:$16 sps:$4 sm:$0xff]  }
 0x284   : > { %v1422_v39 = vpop.f32.mrb[46].mxu0  ;;  %v3381_v20 = vld [vmem:[%s4790_s2 + $0x1a4] ss:$16 sps:$4 sm:$0xff]  }
 0x285   : > { %v1577_v44 = vpack.c.bf16 %v1422_v39, %v1418_v47  ;;  %v1424_v45 = vpop.f32.mrb[47].mxu0  ;;  %v3386_v47 = vld [vmem:[%s4790_s2 + $0xc] ss:$16 sps:$4 sm:$0xff]  }
 0x286   : > { %v1578_v42 = vpack.c.bf16 %v1424_v45, %v1420_v41  ;;  %v3384_v41 = vld [vmem:[%s4790_s2 + $0x8] ss:$16 sps:$4 sm:$0xff]   ;;  %v3387_v39 = vld [vmem:[%s4790_s2 + $0x2c] ss:$16 sps:$4 sm:$0xff]  }
 0x287   : > { %v3390_v45 = vld [vmem:[%s4790_s2 + $0x4c] ss:$16 sps:$4 sm:$0xff]  }
 0x288   : > { %1999 = vmatprep.subr.bf16.mxu1 %v1578_v42  ;;  %v3392_v42 = vld [vmem:[%s4790_s2 + $0x48] ss:$16 sps:$4 sm:$0xff]  }
 0x289   : > { %2000 = vmatpush1.bf16.msra.mxu1 %v1577_v44  ;;  %v3389_v44 = vld [vmem:[%s4790_s2 + $0x28] ss:$16 sps:$4 sm:$0xff]  }
 0x28a   : > { %2001 = vmatprep.subr.bf16.mxu1 %v4812_v50  ;;  %v3393_v50 = vld [vmem:[%s4790_s2 + $0x6c] ss:$16 sps:$4 sm:$0xff]  }
 0x28d   : > { %2002 = vmatpush1.bf16.msra.mxu1 %v4813_v23  ;;  %v3395_v23 = vld [vmem:[%s4790_s2 + $0x68] ss:$16 sps:$4 sm:$0xff]  }
 0x28e   : > { %2003 = vmatprep.subr.bf16.mxu1 %v4814_v28  ;;  %v3396_v28 = vld [vmem:[%s4790_s2 + $0x8c] ss:$16 sps:$4 sm:$0xff]  }
 0x291   : > { %2004 = vmatpush1.bf16.msra.mxu1 %v4815_v56  ;;  %v3398_v56 = vld [vmem:[%s4790_s2 + $0x88] ss:$16 sps:$4 sm:$0xff]  }
 0x292   : > { %2005 = vmatprep.subr.bf16.mxu1 %v4816_v46  ;;  %v3399_v46 = vld [vmem:[%s4790_s2 + $0xac] ss:$16 sps:$4 sm:$0xff]  }
 0x295   : > { %2006 = vmatpush1.bf16.msra.mxu1 %v4817_v61  ;;  %v3401_v61 = vld [vmem:[%s4790_s2 + $0xa8] ss:$16 sps:$4 sm:$0xff]  }
 0x296   : > { %2007 = vmatprep.subr.bf16.mxu1 %v4818_v51  ;;  %v3402_v51 = vld [vmem:[%s4790_s2 + $0xcc] ss:$16 sps:$4 sm:$0xff]  }
 0x299   : > { %2008 = vmatpush1.bf16.msra.mxu1 %v4819_v17  ;;  %v3405_v17 = vld [vmem:[%s4790_s2 + $0xec] ss:$16 sps:$4 sm:$0xff]  }
 0x29a   : > { %2150 = vmatprep.subr.bf16.mxu1 %v4820_v38  ;;  %v3408_v38 = vld [vmem:[%s4790_s2 + $0x10c] ss:$16 sps:$4 sm:$0xff]  }
 0x29c   : > { %2010 = vmatmul.mubr.bf16.vlgmr.msra.gmra.mrb[52].mxu1 %v3342_v7  ;;  %v3404_v7 = vld [vmem:[%s4790_s2 + $0xc8] ss:$16 sps:$4 sm:$0xff]  }
 0x29d   : > { %2151 = vmatpush1.bf16.msra.mxu1 %v4821_v48  ;;  %2019 = vmatprep.mubr.bf16.mxu1 %v3345_v33  ;;  %v3407_v33 = vld [vmem:[%s4790_s2 + $0xe8] ss:$16 sps:$4 sm:$0xff]  }
 0x29e   : > { %2152 = vmatprep.subr.bf16.mxu1 %v4822_v49  ;;  %v3410_v48 = vld [vmem:[%s4790_s2 + $0x108] ss:$16 sps:$4 sm:$0xff]   ;;  %v3411_v49 = vld [vmem:[%s4790_s2 + $0x12c] ss:$16 sps:$4 sm:$0xff]  }
 0x2a1   : > { %2153 = vmatpush1.bf16.msra.mxu1 %v4823_v12  ;;  %v3414_v12 = vld [vmem:[%s4790_s2 + $0x14c] ss:$16 sps:$4 sm:$0xff]  }
 0x2a2   : > { %2154 = vmatprep.subr.bf16.mxu1 %v4824_v53  ;;  %v3417_v53 = vld [vmem:[%s4790_s2 + $0x16c] ss:$16 sps:$4 sm:$0xff]  }
 0x2a4   : > { %2020 = vmatmul.mubr.bf16.gmra.mrb[56].mxu1 %v3347_v2  ;;  %v3413_v2 = vld [vmem:[%s4790_s2 + $0x128] ss:$16 sps:$4 sm:$0xff]  }
 0x2a5   : > { %2155 = vmatpush1.bf16.msra.mxu1 %v4825_v57  ;;  %2029 = vmatprep.mubr.bf16.mxu1 %v3348_v52  ;;  %v3416_v52 = vld [vmem:[%s4790_s2 + $0x148] ss:$16 sps:$4 sm:$0xff]  }
 0x2a6   : > { %2156 = vmatprep.subr.bf16.mxu1 %v4826_v58  ;;  %v3419_v57 = vld [vmem:[%s4790_s2 + $0x168] ss:$16 sps:$4 sm:$0xff]   ;;  %v3420_v58 = vld [vmem:[%s4790_s2 + $0x18c] ss:$16 sps:$4 sm:$0xff]  }
 0x2a9   : > { %2157 = vmatpush1.bf16.msra.mxu1 %v4827_v60  ;;  %v3423_v60 = vld [vmem:[%s4790_s2 + $0x1ac] ss:$16 sps:$4 sm:$0xff]  }
 0x2aa   : > { %2158 = vmatprep.subr.bf16.mxu1 %v4828_v63 }
 0x2ac   : > { %2030 = vmatmul.mubr.bf16.gmra.mrb[60].mxu1 %v3350_v59  ;;  %v3422_v59 = vld [vmem:[%s4790_s2 + $0x188] ss:$16 sps:$4 sm:$0xff]  }
 0x2ad   : > { %2159 = vmatpush1.bf16.msra.mxu1 %v4829_v0  ;;  %2039 = vmatprep.mubr.bf16.mxu1 %v3351_v62  ;;  %v3425_v62 = vld [vmem:[%s4790_s2 + $0x1a8] ss:$16 sps:$4 sm:$0xff]  }
 0x2ae   : > { %2160 = vmatprep.subr.bf16.mxu1 %v4830_v1 }
 0x2b1   : > { %2161 = vmatpush1.bf16.msra.mxu1 %v4831_v4 }
 0x2b2   : > { %2162 = vmatprep.subr.bf16.mxu1 %v4832_v6 }
 0x2b4   : > { %2040 = vmatmul.mubr.bf16.gmra.mrb[64].mxu1 %v3353_v3 }
 0x2b5   : > { %2163 = vmatpush1.bf16.msra.mxu1 %v4833_v8  ;;  %2049 = vmatprep.mubr.bf16.mxu1 %v3354_v5 }
 0x2b6   : > { %2164 = vmatprep.subr.bf16.mxu1 %v4834_v9 }
 0x2b9   : > { %2165 = vmatpush1.bf16.msra.mxu1 %v4839_v19 }
 0x2ba   : > { %2812 = vmatprep.subr.msk.bf16.mxu1 %vm1970_vm0, %v1604_v14 }
 0x2bc   : > { %2050 = vmatmul.mubr.bf16.gmra.mrb[68].mxu1 %v3356_v15 }
 0x2bd   : > { %2167 = vmatpush1.bf16.msra.mxu1 %v1972_v21  ;;  %2059 = vmatprep.mubr.bf16.mxu1 %v3357_v54 }
 0x2c4   : > { %2060 = vmatmul.mubr.bf16.gmra.mrb[72].mxu1 %v3359_v22 }
 0x2c5   : > { %2069 = vmatprep.mubr.bf16.mxu1 %v3360_v24 }
 0x2cc   : > { %2070 = vmatmul.mubr.bf16.gmra.mrb[76].mxu1 %v3362_v25 }
 0x2cd   : > { %2079 = vmatprep.mubr.bf16.mxu1 %v3363_v26 }
 0x2d4   : > { %2080 = vmatmul.mubr.bf16.gmra.mrb[80].mxu1 %v3365_v27 }
 0x2d5   : > { %2089 = vmatprep.mubr.bf16.mxu1 %v3366_v29 }
 0x2dc   : > { %2090 = vmatmul.mubr.bf16.gmra.mrb[84].mxu1 %v3368_v30 }
 0x2dd   : > { %2099 = vmatprep.mubr.bf16.mxu1 %v3369_v31 }
 0x2e4   : > { %2100 = vmatmul.mubr.bf16.gmra.mrb[88].mxu1 %v3371_v32 }
 0x2e5   : > { %2109 = vmatprep.mubr.bf16.mxu1 %v3372_v35 }
 0x2ec   : > { %2110 = vmatmul.mubr.bf16.gmra.mrb[92].mxu1 %v3374_v37 }
 0x2ed   : > { %2119 = vmatprep.mubr.bf16.mxu1 %v3375_v55 }
 0x2f4   : > { %2120 = vmatmul.mubr.bf16.gmra.mrb[96].mxu1 %v3377_v34 }
 0x2f5   : > { %2129 = vmatprep.mubr.bf16.mxu1 %v3378_v43 }
 0x2fc   : > { %2130 = vmatmul.mubr.bf16.gmra.mrb[100].mxu1 %v3380_v36 }
 0x2fd   : > { %2139 = vmatprep.mubr.bf16.mxu1 %v3381_v20 }
 0x304   : > { %2140 = vmatmul.mubr.bf16.gmra.mrb[104].mxu1 %v3383_v40 }
 0x305   : > { %2813 = vmatprep.mubr.msk.bf16.mxu1 %vm1927_vm1, %v3386_v47 }
 0x30c   : > { %2183 = vmatmul.mubr.bf16.vlgmr.msra.gmra.mrb[52].mxu1 %v3384_v41 }
 0x30d   : > { %2814 = vmatprep.mubr.msk.bf16.mxu1 %vm1927_vm1, %v3387_v39 }
 0x314   : > { %2193 = vmatmul.mubr.bf16.gmra.mrb[56].mxu1 %v3389_v44 }
 0x315   : > { %2815 = vmatprep.mubr.msk.bf16.mxu1 %vm1927_vm1, %v3390_v45 }
 0x31c   : > { %2203 = vmatmul.mubr.bf16.gmra.mrb[60].mxu1 %v3392_v42 }
 0x31d   : > { %2816 = vmatprep.mubr.msk.bf16.mxu1 %vm1927_vm1, %v3393_v50 }
 0x324   : > { %2213 = vmatmul.mubr.bf16.gmra.mrb[64].mxu1 %v3395_v23 }
 0x325   : > { %2817 = vmatprep.mubr.msk.bf16.mxu1 %vm1927_vm1, %v3396_v28 }
 0x32c   : > { %2223 = vmatmul.mubr.bf16.gmra.mrb[68].mxu1 %v3398_v56 }
 0x32d   : > { %2818 = vmatprep.mubr.msk.bf16.mxu1 %vm1927_vm1, %v3399_v46 }
 0x334   : > { %2233 = vmatmul.mubr.bf16.gmra.mrb[72].mxu1 %v3401_v61 }
 0x335   : > { %2819 = vmatprep.mubr.msk.bf16.mxu1 %vm1927_vm1, %v3402_v51 }
 0x33c   : > { %2243 = vmatmul.mubr.bf16.gmra.mrb[76].mxu1 %v3404_v7 }
 0x33d   : > { %2820 = vmatprep.mubr.msk.bf16.mxu1 %vm1927_vm1, %v3405_v17 }
 0x344   : > { %2253 = vmatmul.mubr.bf16.gmra.mrb[80].mxu1 %v3407_v33 }
 0x345   : > { %2821 = vmatprep.mubr.msk.bf16.mxu1 %vm1927_vm1, %v3408_v38 }
 0x34c   : > { %2263 = vmatmul.mubr.bf16.gmra.mrb[84].mxu1 %v3410_v48 }
 0x34d   : > { %2822 = vmatprep.mubr.msk.bf16.mxu1 %vm1927_vm1, %v3411_v49 }
 0x354   : > { %2273 = vmatmul.mubr.bf16.gmra.mrb[88].mxu1 %v3413_v2 }
 0x355   : > { %2823 = vmatprep.mubr.msk.bf16.mxu1 %vm1927_vm1, %v3414_v12 }
 0x35c   : > { %2283 = vmatmul.mubr.bf16.gmra.mrb[92].mxu1 %v3416_v52 }
 0x35d   : > { %2824 = vmatprep.mubr.msk.bf16.mxu1 %vm1927_vm1, %v3417_v53 }
 0x364   : > { %2293 = vmatmul.mubr.bf16.gmra.mrb[96].mxu1 %v3419_v57 }
 0x365   : > { %2825 = vmatprep.mubr.msk.bf16.mxu1 %vm1927_vm1, %v3420_v58 }
 0x36c   : > { %2303 = vmatmul.mubr.bf16.gmra.mrb[100].mxu1 %v3422_v59 }
 0x36d   : > { %2826 = vmatprep.mubr.msk.bf16.mxu1 %vm1927_vm1, %v3423_v60 }
 0x374   : > { %2313 = vmatmul.mubr.bf16.gmra.mrb[104].mxu1 %v3425_v62 }
 0x3df   : > { %v2184_v63 = vpop.f32.mrb[52].mxu1 }
 0x3e0   : > { %v2186_v1 = vpop.f32.mrb[53].mxu1 }
 0x3e1   : > { %v2858_v3 = vpack.c.bf16 %v2186_v1, %v2184_v63  ;;  %v2188_v4 = vpop.f32.mrb[54].mxu1 }
 0x3e2   : > { %v2190_v5 = vpop.f32.mrb[55].mxu1 }
 0x3e3   : > { %2493 = vst.msk [vmem:[%s4629_s10] sm:$0xff] %vm4625_vm3, %v2858_v3  ;;  %v2859_v6 = vpack.c.bf16 %v2190_v5, %v2188_v4 }
 0x3e5   : > { %2494 = vst.msk [vmem:[%s4629_s10 + $0x8] sm:$0xff] %vm4625_vm3, %v2859_v6 }
 0x3e7   : > { %v2194_v8 = vpop.f32.mrb[56].mxu1 }
 0x3e8   : > { %v2196_v9 = vpop.f32.mrb[57].mxu1 }
 0x3e9   : > { %v2860_v10 = vpack.c.bf16 %v2196_v9, %v2194_v8  ;;  %v2198_v11 = vpop.f32.mrb[58].mxu1 }
 0x3ea   : > { %v2200_v13 = vpop.f32.mrb[59].mxu1 }
 0x3eb   : > { %2495 = vst.msk [vmem:[%s4629_s10 + $0x10] sm:$0xff] %vm4625_vm3, %v2860_v10  ;;  %v2861_v14 = vpack.c.bf16 %v2200_v13, %v2198_v11 }
 0x3ed   : > { %2496 = vst.msk [vmem:[%s4629_s10 + $0x18] sm:$0xff] %vm4625_vm3, %v2861_v14 }
 0x3ef   : > { %v2204_v15 = vpop.f32.mrb[60].mxu1 }
 0x3f0   : > { %v2206_v16 = vpop.f32.mrb[61].mxu1 }
 0x3f1   : > { %v2862_v18 = vpack.c.bf16 %v2206_v16, %v2204_v15  ;;  %v2208_v19 = vpop.f32.mrb[62].mxu1 }
 0x3f2   : > { %v2210_v54 = vpop.f32.mrb[63].mxu1 }
 0x3f3   : > { %2497 = vst.msk [vmem:[%s4629_s10 + $0x20] sm:$0xff] %vm4625_vm3, %v2862_v18  ;;  %v2863_v21 = vpack.c.bf16 %v2210_v54, %v2208_v19 }
 0x3f5   : > { %2498 = vst.msk [vmem:[%s4629_s10 + $0x28] sm:$0xff] %vm4625_vm3, %v2863_v21 }
 0x3f7   : > { %v2214_v22 = vpop.f32.mrb[64].mxu1 }
 0x3f8   : > { %v2216_v24 = vpop.f32.mrb[65].mxu1 }
 0x3f9   : > { %v2864_v25 = vpack.c.bf16 %v2216_v24, %v2214_v22  ;;  %v2218_v26 = vpop.f32.mrb[66].mxu1 }
 0x3fa   : > { %v2220_v27 = vpop.f32.mrb[67].mxu1 }
 0x3fb   : > { %2499 = vst.msk [vmem:[%s4629_s10 + $0x30] sm:$0xff] %vm4625_vm3, %v2864_v25  ;;  %v2865_v29 = vpack.c.bf16 %v2220_v27, %v2218_v26 }
 0x3fd   : > { %2500 = vst.msk [vmem:[%s4629_s10 + $0x38] sm:$0xff] %vm4625_vm3, %v2865_v29 }
 0x3ff   : > { %v2224_v30 = vpop.f32.mrb[68].mxu1 }
 0x400   : > { %v2226_v31 = vpop.f32.mrb[69].mxu1 }
 0x401   : > { %v2866_v32 = vpack.c.bf16 %v2226_v31, %v2224_v30  ;;  %v2228_v35 = vpop.f32.mrb[70].mxu1 }
 0x402   : > { %v2230_v37 = vpop.f32.mrb[71].mxu1 }
 0x403   : > { %2501 = vst.msk [vmem:[%s4629_s10 + $0x40] sm:$0xff] %vm4625_vm3, %v2866_v32  ;;  %v2867_v55 = vpack.c.bf16 %v2230_v37, %v2228_v35 }
 0x405   : > { %2502 = vst.msk [vmem:[%s4629_s10 + $0x48] sm:$0xff] %vm4625_vm3, %v2867_v55 }
 0x407   : > { %v2234_v34 = vpop.f32.mrb[72].mxu1 }
 0x408   : > { %v2236_v43 = vpop.f32.mrb[73].mxu1 }
 0x409   : > { %v2868_v36 = vpack.c.bf16 %v2236_v43, %v2234_v34  ;;  %v2238_v20 = vpop.f32.mrb[74].mxu1 }
 0x40a   : > { %v2240_v40 = vpop.f32.mrb[75].mxu1 }
 0x40b   : > { %2503 = vst.msk [vmem:[%s4629_s10 + $0x50] sm:$0xff] %vm4625_vm3, %v2868_v36  ;;  %v2869_v47 = vpack.c.bf16 %v2240_v40, %v2238_v20 }
 0x40d   : > { %2504 = vst.msk [vmem:[%s4629_s10 + $0x58] sm:$0xff] %vm4625_vm3, %v2869_v47 }
 0x40f   : > { %v2244_v41 = vpop.f32.mrb[76].mxu1 }
 0x410   : > { %v2246_v39 = vpop.f32.mrb[77].mxu1 }
 0x411   : > { %v2870_v44 = vpack.c.bf16 %v2246_v39, %v2244_v41  ;;  %v2248_v45 = vpop.f32.mrb[78].mxu1 }
 0x412   : > { %v2250_v42 = vpop.f32.mrb[79].mxu1 }
 0x413   : > { %2505 = vst.msk [vmem:[%s4629_s10 + $0x60] sm:$0xff] %vm4625_vm3, %v2870_v44  ;;  %v2871_v50 = vpack.c.bf16 %v2250_v42, %v2248_v45 }
 0x415   : > { %2506 = vst.msk [vmem:[%s4629_s10 + $0x68] sm:$0xff] %vm4625_vm3, %v2871_v50 }
 0x417   : > { %v2254_v23 = vpop.f32.mrb[80].mxu1 }
 0x418   : > { %v2256_v28 = vpop.f32.mrb[81].mxu1 }
 0x419   : > { %v2872_v56 = vpack.c.bf16 %v2256_v28, %v2254_v23  ;;  %v2258_v46 = vpop.f32.mrb[82].mxu1 }
 0x41a   : > { %v2260_v61 = vpop.f32.mrb[83].mxu1 }
 0x41b   : > { %2507 = vst.msk [vmem:[%s4629_s10 + $0x70] sm:$0xff] %vm4625_vm3, %v2872_v56  ;;  %v2873_v51 = vpack.c.bf16 %v2260_v61, %v2258_v46 }
 0x41d   : > { %2508 = vst.msk [vmem:[%s4629_s10 + $0x78] sm:$0xff] %vm4625_vm3, %v2873_v51 }
 0x41f   : > { %v2264_v7 = vpop.f32.mrb[84].mxu1 }
 0x420   : > { %v2266_v17 = vpop.f32.mrb[85].mxu1 }
 0x421   : > { %v2874_v33 = vpack.c.bf16 %v2266_v17, %v2264_v7  ;;  %v2268_v38 = vpop.f32.mrb[86].mxu1 }
 0x422   : > { %v2270_v48 = vpop.f32.mrb[87].mxu1 }
 0x423   : > { %2509 = vst.msk [vmem:[%s4629_s10 + $0x80] sm:$0xff] %vm4625_vm3, %v2874_v33  ;;  %v2875_v49 = vpack.c.bf16 %v2270_v48, %v2268_v38 }
 0x425   : > { %2510 = vst.msk [vmem:[%s4629_s10 + $0x88] sm:$0xff] %vm4625_vm3, %v2875_v49 }
 0x427   : > { %v2274_v2 = vpop.f32.mrb[88].mxu1 }
 0x428   : > { %v2276_v12 = vpop.f32.mrb[89].mxu1 }
 0x429   : > { %v2876_v52 = vpack.c.bf16 %v2276_v12, %v2274_v2  ;;  %v2278_v53 = vpop.f32.mrb[90].mxu1 }
 0x42a   : > { %v2280_v57 = vpop.f32.mrb[91].mxu1 }
 0x42b   : > { %2511 = vst.msk [vmem:[%s4629_s10 + $0x90] sm:$0xff] %vm4625_vm3, %v2876_v52  ;;  %v2877_v58 = vpack.c.bf16 %v2280_v57, %v2278_v53 }
 0x42d   : > { %2512 = vst.msk [vmem:[%s4629_s10 + $0x98] sm:$0xff] %vm4625_vm3, %v2877_v58 }
 0x42f   : > { %v2284_v59 = vpop.f32.mrb[92].mxu1 }
 0x430   : > { %v2286_v60 = vpop.f32.mrb[93].mxu1 }
 0x431   : > { %v2878_v62 = vpack.c.bf16 %v2286_v60, %v2284_v59  ;;  %v2288_v63 = vpop.f32.mrb[94].mxu1 }
 0x432   : > { %v2290_v1 = vpop.f32.mrb[95].mxu1 }
 0x433   : > { %2513 = vst.msk [vmem:[%s4629_s10 + $0xa0] sm:$0xff] %vm4625_vm3, %v2878_v62  ;;  %v2879_v3 = vpack.c.bf16 %v2290_v1, %v2288_v63 }
 0x435   : > { %2514 = vst.msk [vmem:[%s4629_s10 + $0xa8] sm:$0xff] %vm4625_vm3, %v2879_v3 }
 0x437   : > { %v2294_v4 = vpop.f32.mrb[96].mxu1 }
 0x438   : > { %v2296_v5 = vpop.f32.mrb[97].mxu1 }
 0x439   : > { %v2880_v6 = vpack.c.bf16 %v2296_v5, %v2294_v4  ;;  %v2298_v8 = vpop.f32.mrb[98].mxu1 }
 0x43a   : > { %v2300_v9 = vpop.f32.mrb[99].mxu1 }
 0x43b   : > { %2515 = vst.msk [vmem:[%s4629_s10 + $0xb0] sm:$0xff] %vm4625_vm3, %v2880_v6  ;;  %v2881_v10 = vpack.c.bf16 %v2300_v9, %v2298_v8 }
 0x43d   : > { %2516 = vst.msk [vmem:[%s4629_s10 + $0xb8] sm:$0xff] %vm4625_vm3, %v2881_v10 }
 0x43f   : > { %v2304_v11 = vpop.f32.mrb[100].mxu1 }
 0x440   : > { %v2306_v13 = vpop.f32.mrb[101].mxu1 }
 0x441   : > { %v2882_v14 = vpack.c.bf16 %v2306_v13, %v2304_v11  ;;  %v2308_v15 = vpop.f32.mrb[102].mxu1 }
 0x442   : > { %v2310_v16 = vpop.f32.mrb[103].mxu1 }
 0x443   : > { %2517 = vst.msk [vmem:[%s4629_s10 + $0xc0] sm:$0xff] %vm4625_vm3, %v2882_v14  ;;  %v2883_v18 = vpack.c.bf16 %v2310_v16, %v2308_v15 }
 0x445   : > { %2518 = vst.msk [vmem:[%s4629_s10 + $0xc8] sm:$0xff] %vm4625_vm3, %v2883_v18 }
 0x447   : > { %v2314_v19 = vpop.f32.mrb[104].mxu1 }
 0x448   : > { %v2316_v54 = vpop.f32.mrb[105].mxu1 }
 0x449   : > { %v2884_v21 = vpack.c.bf16 %v2316_v54, %v2314_v19  ;;  %v2318_v22 = vpop.f32.mrb[106].mxu1 }
 0x44a   : > { %v2320_v24 = vpop.f32.mrb[107].mxu1 }
 0x44b   : > { %2519 = vst.msk [vmem:[%s4629_s10 + $0xd0] sm:$0xff] %vm4625_vm3, %v2884_v21  ;;  %v2885_v25 = vpack.c.bf16 %v2320_v24, %v2318_v22 }
 0x44d   : > { %2520 = vst.msk [vmem:[%s4629_s10 + $0xd8] sm:$0xff] %vm4625_vm3, %v2885_v25 }
 0x44e   : > { %3469 = shalt.err (!%p3466_p8)
}
 0x44f   : > { %s3470_s23 = scalar_lea.hbm %s4715_s5, 3584  ;;  %s3474_s10 = scalar_lea.hbm %s4791_s3, 21504 }
 0x450   : > { %p3471_p10 = scmp.ne.s32.totalorder %s4715_s5, %s3470_s23  ;;  %p3475_p4 = scmp.lt.u32.totalorder %s4715_s5, %s4791_s3 }
 0x451   : > { %p3476_p6 = scmp.lt.u32.totalorder %s3474_s10, %s3470_s23  ;;  %p3478_p7 = scmp.lt.u32.totalorder %s3470_s23, %s4715_s5 }
 0x452   : > { %p3472_p11 = pnand %p3471_p10, %p4842_p0 }
 0x453   : > { %p3477_p9 = por %p3476_p6, %p3475_p4 }
 0x454   : > { %p3473_p12 = pneg %p3472_p11 }
 0x455   : > { %p3479_p2 = por %p3478_p7, %p3477_p9 }
 0x457   : > { %p3480_p3 = pnand %p3479_p2, %p3473_p12 }
 0x459   : > { %3483 = shalt.err (!%p3480_p3)
}
 0x45a   : > { %s3586_s28 = smov 128   ;;  %s3587_s6 = smov 8  }
 0x45b   : > { %3065 = dma.vmem_to_hbm [thread:$0]  (%p4842_p0), %s4717_s18, 3584, %s4715_s5, %s4727_s26, %s3586_s28, %s3586_s28, %s3587_s6  }
 0x45c PF: > { %p3076_p13 = scmp.ge.s32.totalorder %s3578_s22, 2  ;;  %s2552_s19 = sand.u32 1, %s3538_s12  }
 0x45d   : > { %p4843_p1 = scmp.ne.s32.totalorder %s4805_s30, 0  ;;  %s2553_s25 = scalar_lea.sflag [#allocation4], %s2552_s19 }
 0x45f   : > { %p3072_p5 = pnand %p3076_p13, %p4843_p1 }
 0x461   : > { %3533 = dma.done.wait (!%p3072_p5), %s2553_s25, 3584  }
 0x462   : > { %3535 = vsyncadd (!%p3072_p5), %s2553_s25, 4294963712  ;;  %s19_s22 = sadd.s32 1, %s3578_s22   ;;  %s4844_s29 = sld [smem:[#allocation8_spill]] }
 0x463   : > { %p16_p8 = scmp.ge.s32.totalorder %s19_s22, 8   ;;  %s4845_s17 = sld [smem:[#allocation11_spill]] }
 0x464   : > { %s4846_s5 = sld [smem:[#allocation9_spill]]  ;;  %s4847_s26 = sld [smem:[#allocation10_spill]] }
 0x465   : > { %s4848_s12 = smov %s3542_s13  ;;  %s4849_s13 = smov %s3546_s14 }
 0x466   : > { %s4850_s14 = smov %s3703_s15  ;;  %s4851_s15 = smov %s3554_s16 }
 0x467   : > { %s4853_s18 = smov %s3570_s20  ;;  %s4854_s19 = smov %s3574_s21 }
 0x468   : > { %s4852_s16 = smov %s4844_s29  ;;  %18 = sbr.rel (!%p16_p8) target bundleno = 9 (0x9), region = 77 }
 0x46a   : > { %s4855_s20 = smov %s4846_s5  ;;  %s4856_s21 = smov %s4847_s26 }
 0x46f   :  { %2558 = vsyncpa [#allocation3], 1 }
 0x470   :  { %2560 = vsyncpa [#allocation3 + $0x1], 1 }
 0x471   :  { %2561 = vsyncpa [#allocation4], 1 }
 0x472   :  { %2563 = vsyncpa [#allocation4 + $0x1], 1 }

</bundles_post_ra>
